<compile_context>
chip_gen: v7x
topology: tpu7x:2x2x1
jax: 0.10.0
libtpu: 0.0.40
codegen_flags: <defaults>
</compile_context>

<pallas_src>
import functools
import math

import jax
import jax.numpy as jnp
from jax.experimental import pallas as pl
from jax.experimental.pallas import tpu as pltpu

EPS = 1e-6


def _layernorm(x, gamma, beta, d_real, dmask, approx):
    # x: (rows, Dp) with padded columns exactly zero; gamma/beta: (1, Dp) zero-padded.
    # Unbiased variance (D-1) and eps added to std, matching the torch module.
    mean = jnp.sum(x, axis=-1, keepdims=True) * (1.0 / d_real)
    centered = (x - mean) * dmask                    # zero the padded lanes before the stats
    var = jnp.sum(centered * centered, axis=-1, keepdims=True) * (1.0 / (d_real - 1))
    inv = pl.reciprocal(jnp.sqrt(var) + EPS, approx=approx)   # EUP slot when approx=True
    return gamma * (centered * inv) + beta


def encoder_kernel(x_ref,
                   wqkv_ref, bqkv_ref, wo_ref, bo_ref,
                   w1_ref, b1_ref, w2_ref, b2_ref,
                   g1_ref, be1_ref, g2_ref, be2_ref,
                   gf_ref, bf_ref,
                   o_ref, carry_ref,
                   *, num_heads, d_real, compute_dtype, approx):
    layer = pl.program_id(1)
    num_layers = pl.num_programs(1)
    Bt, S, Dp = x_ref.shape
    BS = Bt * S
    H = num_heads
    dk = d_real // H
    inv_sqrt_dk = 1.0 / math.sqrt(dk)

    # Lane mask selecting the real (un-padded) feature columns.
    lane = jax.lax.broadcasted_iota(jnp.int32, (1, Dp), 1)
    dmask = (lane < d_real).astype(jnp.float32)

    # Load the input activation once per batch tile; afterwards the running activation lives
    # in the f32 VMEM carry (single HBM round-trip for the whole layer stack).
    @pl.when(layer == 0)
    def _():
        carry_ref[...] = x_ref[...].reshape(BS, Dp).astype(jnp.float32)

    x = carry_ref[...]                                                   # (BS, Dp) f32

    # ---- sublayer 1: pre-norm multi-head self-attention + residual ----
    ln1 = _layernorm(x, g1_ref[0], be1_ref[0], d_real, dmask, approx)
    ln1_c = ln1.astype(compute_dtype)

    # Fused lane-dense QKV projection: (BS, Dp) @ (Dp, 3*Dp).
    qkv = jnp.dot(ln1_c, wqkv_ref[0].astype(compute_dtype),
                  preferred_element_type=jnp.float32) + bqkv_ref[0]      # (BS, 3*Dp) f32

    attn_out = jnp.zeros((BS, Dp), jnp.float32)
    for h in range(H):                       # small static head loop; batch is einsum-batched
        qh = qkv[:, h * dk:(h + 1) * dk].reshape(Bt, S, dk).astype(compute_dtype)
        kh = qkv[:, Dp + h * dk:Dp + (h + 1) * dk].reshape(Bt, S, dk).astype(compute_dtype)
        vh = qkv[:, 2 * Dp + h * dk:2 * Dp + (h + 1) * dk].reshape(Bt, S, dk).astype(compute_dtype)

        scores = jnp.einsum('bqc,bkc->bqk', qh, kh,
                            preferred_element_type=jnp.float32) * inv_sqrt_dk
        scores = scores - jnp.max(scores, axis=-1, keepdims=True)
        p = jnp.exp(scores)
        p = p * pl.reciprocal(jnp.sum(p, axis=-1, keepdims=True), approx=approx)

        ctx = jnp.einsum('bqk,bkc->bqc', p.astype(compute_dtype), vh,
                         preferred_element_type=jnp.float32)             # (Bt, S, dk)
        # Merge heads without concat/transpose: sum_h ctx_h @ Wo_h  (N = Dp lanes).
        attn_out += jnp.dot(ctx.reshape(BS, dk).astype(compute_dtype),
                            wo_ref[0, h].astype(compute_dtype),
                            preferred_element_type=jnp.float32)

    x1 = x + attn_out + bo_ref[0]                        # dropout = identity (eval mode)

    # ---- sublayer 2: pre-norm feed-forward + residual ----
    ln2 = _layernorm(x1, g2_ref[0], be2_ref[0], d_real, dmask, approx)
    hmid = jnp.dot(ln2.astype(compute_dtype), w1_ref[0].astype(compute_dtype),
                   preferred_element_type=jnp.float32) + b1_ref[0]
    hmid = jnp.maximum(hmid, 0.0)                                        # ReLU
    ffn = jnp.dot(hmid.astype(compute_dtype), w2_ref[0].astype(compute_dtype),
                  preferred_element_type=jnp.float32) + b2_ref[0]
    x2 = x1 + ffn

    @pl.when(layer < num_layers - 1)
    def _():
        carry_ref[...] = x2                  # not needed on the last layer (read from regs)

    @pl.when(layer == num_layers - 1)
    def _():
        y = _layernorm(x2, gf_ref[...], bf_ref[...], d_real, dmask, approx)
        o_ref[...] = y.reshape(Bt, S, Dp).astype(o_ref.dtype)


# ------------------------------ wrapper -------------------------------------
def pack_params(layer_params, num_heads, d_pad, h_pad, compute_dtype):
    """Stack per-layer params along a leading layer axis, fuse QKV, pad to lane multiples."""
    D = layer_params[0]["wq"].shape[0]
    dk = D // num_heads

    def pad2(a, r, c):
        return jnp.pad(a, ((0, r - a.shape[0]), (0, c - a.shape[1])))

    acc = {k: [] for k in ["wqkv", "bqkv", "wo", "bo", "w1", "b1", "w2", "b2",
                           "g1", "be1", "g2", "be2"]}
    for p in layer_params:
        acc["wqkv"].append(jnp.concatenate(
            [pad2(p["wq"], d_pad, d_pad), pad2(p["wk"], d_pad, d_pad),
             pad2(p["wv"], d_pad, d_pad)], axis=1))                       # (Dp, 3Dp)
        acc["bqkv"].append(jnp.concatenate(
            [pad2(p["bq"], 1, d_pad), pad2(p["bk"], 1, d_pad),
             pad2(p["bv"], 1, d_pad)], axis=1))                           # (1, 3Dp)
        acc["wo"].append(jnp.pad(p["wo"].reshape(num_heads, dk, D),
                                 ((0, 0), (0, 0), (0, d_pad - D))))       # (H, dk, Dp)
        acc["bo"].append(pad2(p["bo"], 1, d_pad))
        acc["w1"].append(pad2(p["w1"], d_pad, h_pad))
        acc["b1"].append(pad2(p["b1"], 1, h_pad))
        acc["w2"].append(pad2(p["w2"], h_pad, d_pad))
        acc["b2"].append(pad2(p["b2"], 1, d_pad))
        acc["g1"].append(pad2(p["g1"], 1, d_pad))
        acc["be1"].append(pad2(p["be1"], 1, d_pad))
        acc["g2"].append(pad2(p["g2"], 1, d_pad))
        acc["be2"].append(pad2(p["be2"], 1, d_pad))

    st = lambda xs: jnp.stack(xs, axis=0)
    out = {k: st(v) for k, v in acc.items()}
    for k in ("wqkv", "wo", "w1", "w2"):        # MXU-input weights in compute dtype (bf16 default)
        out[k] = out[k].astype(compute_dtype)
    return out


def encoder_forward(x, layer_params, final_gamma, final_beta, num_heads,
                    compute_dtype=jnp.bfloat16,     # bf16 MXU inputs, f32 accumulation
                    approx_recip=True,              # EUP reciprocal for softmax / LN inverse
                    batch_tile=1,                   # leading "parallel" grid axis (v7x megacore)
                    weight_buffers=2,               # raise to 3 on v5e if weight DMA is exposed
                    lane_pad=128):
    B, S, D = x.shape
    L = len(layer_params)
    hidden = layer_params[0]["w1"].shape[1]
    assert B % batch_tile == 0, "batch_tile must divide B"
    d_pad = ((D + lane_pad - 1) // lane_pad) * lane_pad
    h_pad = ((hidden + lane_pad - 1) // lane_pad) * lane_pad

    packed = pack_params(layer_params, num_heads, d_pad, h_pad, compute_dtype)
    order = ["wqkv", "bqkv", "wo", "bo", "w1", "b1", "w2", "b2", "g1", "be1", "g2", "be2"]
    weights = [packed[k] for k in order]

    x_p = jnp.pad(x, ((0, 0), (0, 0), (0, d_pad - D)))
    gf = jnp.pad(final_gamma, ((0, 0), (0, d_pad - D)))
    bf = jnp.pad(final_beta, ((0, 0), (0, d_pad - D)))

    def per_layer_spec(arr):                       # stream layer l's slice each grid step
        nd = arr.ndim
        kw = {}
        if weight_buffers != 2:
            kw["pipeline_mode"] = pl.Buffered(weight_buffers)
        return pl.BlockSpec((1,) + arr.shape[1:],
                            lambda b, l, _nd=nd: (l,) + (0,) * (_nd - 1), **kw)

    def whole_spec(arr):                           # constant block: loaded once
        nd = arr.ndim
        return pl.BlockSpec(arr.shape, lambda b, l, _nd=nd: (0,) * _nd)

    x_spec = pl.BlockSpec((batch_tile, S, d_pad), lambda b, l: (b, 0, 0))
    out_spec = pl.BlockSpec((batch_tile, S, d_pad), lambda b, l: (b, 0, 0))
    in_specs = [x_spec] + [per_layer_spec(w) for w in weights] + [whole_spec(gf), whole_spec(bf)]

    # Explicit VMEM budget (double-buffered per-layer weights + activation blocks + carry).
    nbytes = lambda a: int(a.size) * a.dtype.itemsize
    per_layer_weight_bytes = sum(nbytes(w) // L for w in weights)
    act_block_bytes = batch_tile * S * d_pad * jnp.dtype(x.dtype).itemsize
    carry_bytes = batch_tile * S * d_pad * 4
    budget = (weight_buffers * per_layer_weight_bytes + 4 * act_block_bytes
              + carry_bytes + nbytes(gf) + nbytes(bf))
    vmem_limit = int(min(max(2 * budget + (4 << 20), 32 << 20), 96 << 20))

    out = pl.pallas_call(
        functools.partial(encoder_kernel, num_heads=num_heads, d_real=D,
                          compute_dtype=compute_dtype, approx=approx_recip),
        out_shape=jax.ShapeDtypeStruct((B, S, d_pad), x.dtype),
        grid=(B // batch_tile, L),
        in_specs=in_specs,
        out_specs=out_spec,
        scratch_shapes=[pltpu.VMEM((batch_tile * S, d_pad), jnp.float32)],  # activation carry
        compiler_params=pltpu.CompilerParams(
            dimension_semantics=("parallel", "arbitrary"),   # batch tiles parallel, layers serial
            vmem_limit_bytes=vmem_limit),
    )(x_p, *weights, gf, bf)
    return out[:, :, :D]


# -------------------- pure-JAX reference for verification --------------------
def _ref_layernorm(x, g, b):
    d = x.shape[-1]
    mean = jnp.mean(x, axis=-1, keepdims=True)
    var = jnp.sum((x - mean) ** 2, axis=-1, keepdims=True) / (d - 1)
    return g * (x - mean) / (jnp.sqrt(var) + EPS) + b


def ref_encoder(x, layer_params, final_gamma, final_beta, num_heads):
    B, S, D = x.shape
    dk = D // num_heads
    for p in layer_params:
        ln1 = _ref_layernorm(x, p["g1"], p["be1"])
        q = ln1 @ p["wq"] + p["bq"]
        k = ln1 @ p["wk"] + p["bk"]
        v = ln1 @ p["wv"] + p["bv"]
        qh = q.reshape(B, S, num_heads, dk).transpose(0, 2, 1, 3)
        kh = k.reshape(B, S, num_heads, dk).transpose(0, 2, 1, 3)
        vh = v.reshape(B, S, num_heads, dk).transpose(0, 2, 1, 3)
        scores = jnp.einsum("bhqd,bhkd->bhqk", qh, kh) / math.sqrt(dk)
        attn = jax.nn.softmax(scores, axis=-1)
        ctx = jnp.einsum("bhqk,bhkd->bhqd", attn, vh).transpose(0, 2, 1, 3).reshape(B, S, D)
        x1 = x + (ctx @ p["wo"] + p["bo"])
        ln2 = _ref_layernorm(x1, p["g2"], p["be2"])
        ffn = jnp.maximum(ln2 @ p["w1"] + p["b1"], 0.0) @ p["w2"] + p["b2"]
        x = x1 + ffn
    return _ref_layernorm(x, final_gamma, final_beta)


# ------------------------------ parameter init -------------------------------
def init_params(key, num_layers, dim, hidden_dim):
    layers = []
    scale = 0.05
    for _ in range(num_layers):
        key, k1, k2, k3, k4, k5, k6 = jax.random.split(key, 7)
        layers.append(dict(
            wq=scale * jax.random.normal(k1, (dim, dim), jnp.float32),
            bq=jnp.zeros((1, dim), jnp.float32),
            wk=scale * jax.random.normal(k2, (dim, dim), jnp.float32),
            bk=jnp.zeros((1, dim), jnp.float32),
            wv=scale * jax.random.normal(k3, (dim, dim), jnp.float32),
            bv=jnp.zeros((1, dim), jnp.float32),
            wo=scale * jax.random.normal(k4, (dim, dim), jnp.float32),
            bo=jnp.zeros((1, dim), jnp.float32),
            w1=scale * jax.random.normal(k5, (dim, hidden_dim), jnp.float32),
            b1=jnp.zeros((1, hidden_dim), jnp.float32),
            w2=scale * jax.random.normal(k6, (hidden_dim, dim), jnp.float32),
            b2=jnp.zeros((1, dim), jnp.float32),
            g1=jnp.ones((1, dim), jnp.float32),
            be1=jnp.zeros((1, dim), jnp.float32),
            g2=jnp.ones((1, dim), jnp.float32),
            be2=jnp.zeros((1, dim), jnp.float32),
        ))
    final_gamma = jnp.ones((1, dim), jnp.float32)
    final_beta = jnp.zeros((1, dim), jnp.float32)
    return layers, final_gamma, final_beta, key


if __name__ == "__main__":
    # Shapes consistent with the module: Encoder(number_of_layers=2, head=4,
    # dimension=32, hidden_dimension=64, dropout=0.1) applied to [B=2, S=8, D=32].
    NUM_LAYERS, HEADS, DIM, HIDDEN = 2, 4, 32, 64
    B, S = 2, 8

    key = jax.random.PRNGKey(0)
    layer_params, fg, fb, key = init_params(key, NUM_LAYERS, DIM, HIDDEN)
    key, kx = jax.random.split(key)
    x = jax.random.normal(kx, (B, S, DIM), jnp.float32)

    ref = jax.block_until_ready(ref_encoder(x, layer_params, fg, fb, HEADS))

    # Exact path (f32 MXU inputs, exact reciprocal) — tight check against the reference.
    out_f32 = jax.block_until_ready(
        encoder_forward(x, layer_params, fg, fb, HEADS,
                        compute_dtype=jnp.float32, approx_recip=False))
    assert out_f32.shape == (B, S, DIM)
    assert jnp.allclose(out_f32, ref, atol=5e-4, rtol=5e-4), (
        f"f32 max abs err {float(jnp.max(jnp.abs(out_f32 - ref)))}")

    # Default fast path: bf16 MXU inputs + EUP approx reciprocal — loose check.
    out_fast = jax.block_until_ready(
        encoder_forward(x, layer_params, fg, fb, HEADS))
    assert out_fast.shape == (B, S, DIM)
    assert jnp.allclose(out_fast, ref, atol=1.5e-1, rtol=1.5e-1), (
        f"bf16 max abs err {float(jnp.max(jnp.abs(out_fast - ref)))}")

    print("KERNEL_OK")
</pallas_src>

<mosaic_0001>
module attributes {stable_mosaic.version = 11 : i64} {
  func.func @encoder_kernel(%arg0: i32, %arg1: i32, %arg2: memref<1x8x128xf32, #tpu.memory_space<vmem>>, %arg3: memref<1x128x384xf32, #tpu.memory_space<vmem>>, %arg4: memref<1x1x384xf32, #tpu.memory_space<vmem>>, %arg5: memref<1x4x8x128xf32, #tpu.memory_space<vmem>>, %arg6: memref<1x1x128xf32, #tpu.memory_space<vmem>>, %arg7: memref<1x128x128xf32, #tpu.memory_space<vmem>>, %arg8: memref<1x1x128xf32, #tpu.memory_space<vmem>>, %arg9: memref<1x128x128xf32, #tpu.memory_space<vmem>>, %arg10: memref<1x1x128xf32, #tpu.memory_space<vmem>>, %arg11: memref<1x1x128xf32, #tpu.memory_space<vmem>>, %arg12: memref<1x1x128xf32, #tpu.memory_space<vmem>>, %arg13: memref<1x1x128xf32, #tpu.memory_space<vmem>>, %arg14: memref<1x1x128xf32, #tpu.memory_space<vmem>>, %arg15: memref<1x128xf32, #tpu.memory_space<vmem>>, %arg16: memref<1x128xf32, #tpu.memory_space<vmem>>, %arg17: memref<1x8x128xf32, #tpu.memory_space<vmem>>, %arg18: memref<8x128xf32, #tpu.memory_space<vmem>>) attributes {dimension_semantics = [#tpu.dimension_semantics<parallel>, #tpu.dimension_semantics<arbitrary>], iteration_bounds = array<i64: 2, 2>, scalar_prefetch = 0 : i64, scratch_operands = 1 : i64, tpu.core_type = #tpu.core_type<tc>, window_params = [{transform_indices = @transform_0, window_bounds = array<i64: 1, 8, 128>}, {transform_indices = @transform_1, window_bounds = array<i64: 1, 128, 384>}, {transform_indices = @transform_2, window_bounds = array<i64: 1, 1, 384>}, {transform_indices = @transform_3, window_bounds = array<i64: 1, 4, 8, 128>}, {transform_indices = @transform_4, window_bounds = array<i64: 1, 1, 128>}, {transform_indices = @transform_5, window_bounds = array<i64: 1, 128, 128>}, {transform_indices = @transform_6, window_bounds = array<i64: 1, 1, 128>}, {transform_indices = @transform_7, window_bounds = array<i64: 1, 128, 128>}, {transform_indices = @transform_8, window_bounds = array<i64: 1, 1, 128>}, {transform_indices = @transform_9, window_bounds = array<i64: 1, 1, 128>}, {transform_indices = @transform_10, window_bounds = array<i64: 1, 1, 128>}, {transform_indices = @transform_11, window_bounds = array<i64: 1, 1, 128>}, {transform_indices = @transform_12, window_bounds = array<i64: 1, 1, 128>}, {pipeline_mode = #tpu.pipeline_mode<synchronous>, transform_indices = @transform_13, window_bounds = array<i64: 1, 128>}, {pipeline_mode = #tpu.pipeline_mode<synchronous>, transform_indices = @transform_14, window_bounds = array<i64: 1, 128>}, {transform_indices = @transform_15, window_bounds = array<i64: 1, 8, 128>}]} {
    %0 = tpu.iota {dimensions = array<i32: 1>} : vector<1x128xi32>
    %c32_i32 = arith.constant 32 : i32
    %1 = vector.broadcast %c32_i32 : i32 to vector<1x128xi32>
    %2 = arith.cmpi slt, %0, %1 : vector<1x128xi32>
    %3 = arith.extui %2 : vector<1x128xi1> to vector<1x128xi32>
    %4 = arith.sitofp %3 : vector<1x128xi32> to vector<1x128xf32>
    %c0_i32 = arith.constant 0 : i32
    %5 = arith.cmpi eq, %arg1, %c0_i32 : i32
    %6 = arith.extui %5 : i1 to i32
    %c0_i32_0 = arith.constant 0 : i32
    %7 = arith.cmpi ne, %6, %c0_i32_0 : i32
    scf.if %7 {
      %c0_89 = arith.constant 0 : index
      %c0_90 = arith.constant 0 : index
      %c0_91 = arith.constant 0 : index
      %199 = vector.load %arg2[%c0_89, %c0_90, %c0_91] : memref<1x8x128xf32, #tpu.memory_space<vmem>>, vector<1x8x128xf32>
      %200 = vector.shape_cast %199 : vector<1x8x128xf32> to vector<8x128xf32>
      %c0_92 = arith.constant 0 : index
      %c0_93 = arith.constant 0 : index
      %201 = vector.load %arg18[%c0_92, %c0_93] : memref<8x128xf32, #tpu.memory_space<vmem>>, vector<8x128xf32>
      tpu.vector_store %arg18[%c0_92, %c0_93], %200 {strides = array<i32>} : memref<8x128xf32, #tpu.memory_space<vmem>>, vector<8x128xf32>,
    } else {
    }
    %c0 = arith.constant 0 : index
    %c0_1 = arith.constant 0 : index
    %8 = vector.load %arg18[%c0, %c0_1] : memref<8x128xf32, #tpu.memory_space<vmem>>, vector<8x128xf32>
    %c0_2 = arith.constant 0 : index
    %c0_3 = arith.constant 0 : index
    %c0_4 = arith.constant 0 : index
    %9 = vector.load %arg11[%c0_2, %c0_3, %c0_4] : memref<1x1x128xf32, #tpu.memory_space<vmem>>, vector<1x1x128xf32>
    %10 = vector.shape_cast %9 : vector<1x1x128xf32> to vector<1x128xf32>
    %c0_5 = arith.constant 0 : index
    %c0_6 = arith.constant 0 : index
    %c0_7 = arith.constant 0 : index
    %11 = vector.load %arg12[%c0_5, %c0_6, %c0_7] : memref<1x1x128xf32, #tpu.memory_space<vmem>>, vector<1x1x128xf32>
    %12 = vector.shape_cast %11 : vector<1x1x128xf32> to vector<1x128xf32>
    %cst = arith.constant dense<0.000000e+00> : vector<8xf32>
    %13 = vector.multi_reduction <add>, %8, %cst [1] : vector<8x128xf32> to vector<8xf32>
    %14 = vector.shape_cast %13 : vector<8xf32> to vector<8x1xf32>
    %cst_8 = arith.constant 3.125000e-02 : f32
    %15 = vector.broadcast %cst_8 : f32 to vector<8x1xf32>
    %16 = arith.mulf %14, %15 : vector<8x1xf32>
    %17 = vector.broadcast %16 : vector<8x1xf32> to vector<8x128xf32>
    %18 = arith.subf %8, %17 : vector<8x128xf32>
    %19 = vector.broadcast %4 : vector<1x128xf32> to vector<8x128xf32>
    %20 = arith.mulf %18, %19 : vector<8x128xf32>
    %21 = arith.mulf %20, %20 : vector<8x128xf32>
    %cst_9 = arith.constant dense<0.000000e+00> : vector<8xf32>
    %22 = vector.multi_reduction <add>, %21, %cst_9 [1] : vector<8x128xf32> to vector<8xf32>
    %23 = vector.shape_cast %22 : vector<8xf32> to vector<8x1xf32>
    %cst_10 = arith.constant 0.0322580636 : f32
    %24 = vector.broadcast %cst_10 : f32 to vector<8x1xf32>
    %25 = arith.mulf %23, %24 : vector<8x1xf32>
    %26 = math.sqrt %25 : vector<8x1xf32>
    %cst_11 = arith.constant 9.99999997E-7 : f32
    %27 = vector.broadcast %cst_11 : f32 to vector<8x1xf32>
    %28 = arith.addf %26, %27 : vector<8x1xf32>
    %29 = tpu.reciprocal %28 : vector<8x1xf32> -> vector<8x1xf32>
    %30 = vector.broadcast %29 : vector<8x1xf32> to vector<8x128xf32>
    %31 = arith.mulf %20, %30 : vector<8x128xf32>
    %32 = vector.broadcast %10 : vector<1x128xf32> to vector<8x128xf32>
    %33 = arith.mulf %32, %31 : vector<8x128xf32>
    %34 = vector.broadcast %12 : vector<1x128xf32> to vector<8x128xf32>
    %35 = arith.addf %33, %34 : vector<8x128xf32>
    %c0_12 = arith.constant 0 : index
    %c0_13 = arith.constant 0 : index
    %c0_14 = arith.constant 0 : index
    %36 = vector.load %arg3[%c0_12, %c0_13, %c0_14] : memref<1x128x384xf32, #tpu.memory_space<vmem>>, vector<1x128x384xf32>
    %37 = vector.shape_cast %36 : vector<1x128x384xf32> to vector<128x384xf32>
    %cst_15 = arith.constant dense<0.000000e+00> : vector<8x384xf32>
    %38 = tpu.matmul %35, %37, %cst_15 {dimension_numbers = #tpu.dot_dimension_numbers<[1], [0], [0], [1], [0, 0, 1, 1], [], []>} : vector<8x128xf32>, vector<128x384xf32>, vector<8x384xf32> -> vector<8x384xf32>
    %c0_16 = arith.constant 0 : index
    %c0_17 = arith.constant 0 : index
    %c0_18 = arith.constant 0 : index
    %39 = vector.load %arg4[%c0_16, %c0_17, %c0_18] : memref<1x1x384xf32, #tpu.memory_space<vmem>>, vector<1x1x384xf32>
    %40 = vector.shape_cast %39 : vector<1x1x384xf32> to vector<1x384xf32>
    %41 = vector.broadcast %40 : vector<1x384xf32> to vector<8x384xf32>
    %42 = arith.addf %38, %41 : vector<8x384xf32>
    %cst_19 = arith.constant 0.000000e+00 : f32
    %43 = vector.broadcast %cst_19 : f32 to vector<8x128xf32>
    %44 = vector.extract_strided_slice %42 {offsets = [0, 0], sizes = [8, 8], strides = [1, 1]} : vector<8x384xf32> to vector<8x8xf32>
    %45 = vector.shape_cast %44 : vector<8x8xf32> to vector<1x8x8xf32>
    %46 = vector.extract_strided_slice %42 {offsets = [0, 128], sizes = [8, 8], strides = [1, 1]} : vector<8x384xf32> to vector<8x8xf32>
    %47 = vector.shape_cast %46 : vector<8x8xf32> to vector<1x8x8xf32>
    %48 = vector.extract_strided_slice %42 {offsets = [0, 256], sizes = [8, 8], strides = [1, 1]} : vector<8x384xf32> to vector<8x8xf32>
    %49 = vector.shape_cast %48 : vector<8x8xf32> to vector<1x8x8xf32>
    "tpu.trace_start"() <{level = 10 : i32, message = "bqc,bkc->bqk"}> : () -> ()
    %cst_20 = arith.constant dense<0.000000e+00> : vector<1x8x8xf32>
    %50 = tpu.matmul %45, %47, %cst_20 {dimension_numbers = #tpu.dot_dimension_numbers<[2], [2], [1], [1], [0, 0, 0, 1, 1, 1], [0], [0]>} : vector<1x8x8xf32>, vector<1x8x8xf32>, vector<1x8x8xf32> -> vector<1x8x8xf32>
    "tpu.trace_stop"() : () -> ()
    %cst_21 = arith.constant 0.353553385 : f32
    %51 = vector.broadcast %cst_21 : f32 to vector<1x8x8xf32>
    %52 = arith.mulf %50, %51 : vector<1x8x8xf32>
    %cst_22 = arith.constant dense<0xFF800000> : vector<1x8xf32>
    %53 = vector.multi_reduction <maximumf>, %52, %cst_22 [2] : vector<1x8x8xf32> to vector<1x8xf32>
    %54 = vector.shape_cast %53 : vector<1x8xf32> to vector<1x8x1xf32>
    %55 = vector.broadcast %54 : vector<1x8x1xf32> to vector<1x8x8xf32>
    %56 = arith.subf %52, %55 : vector<1x8x8xf32>
    %57 = math.exp %56 : vector<1x8x8xf32>
    %cst_23 = arith.constant dense<0.000000e+00> : vector<1x8xf32>
    %58 = vector.multi_reduction <add>, %57, %cst_23 [2] : vector<1x8x8xf32> to vector<1x8xf32>
    %59 = vector.shape_cast %58 : vector<1x8xf32> to vector<1x8x1xf32>
    %60 = tpu.reciprocal %59 : vector<1x8x1xf32> -> vector<1x8x1xf32>
    %61 = vector.broadcast %60 : vector<1x8x1xf32> to vector<1x8x8xf32>
    %62 = arith.mulf %57, %61 : vector<1x8x8xf32>
    "tpu.trace_start"() <{level = 10 : i32, message = "bqk,bkc->bqc"}> : () -> ()
    %cst_24 = arith.constant dense<0.000000e+00> : vector<1x8x8xf32>
    %63 = tpu.matmul %62, %49, %cst_24 {dimension_numbers = #tpu.dot_dimension_numbers<[2], [1], [1], [2], [0, 0, 0, 1, 1, 2], [0], [0]>} : vector<1x8x8xf32>, vector<1x8x8xf32>, vector<1x8x8xf32> -> vector<1x8x8xf32>
    "tpu.trace_stop"() : () -> ()
    %64 = vector.shape_cast %63 : vector<1x8x8xf32> to vector<8x8xf32>
    %c0_25 = arith.constant 0 : index
    %c0_26 = arith.constant 0 : index
    %c0_27 = arith.constant 0 : index
    %c0_28 = arith.constant 0 : index
    %65 = vector.load %arg5[%c0_25, %c0_26, %c0_27, %c0_28] : memref<1x4x8x128xf32, #tpu.memory_space<vmem>>, vector<1x1x8x128xf32>
    %66 = vector.shape_cast %65 : vector<1x1x8x128xf32> to vector<8x128xf32>
    %cst_29 = arith.constant dense<0.000000e+00> : vector<8x128xf32>
    %67 = tpu.matmul %64, %66, %cst_29 {dimension_numbers = #tpu.dot_dimension_numbers<[1], [0], [0], [1], [0, 0, 1, 1], [], []>} : vector<8x8xf32>, vector<8x128xf32>, vector<8x128xf32> -> vector<8x128xf32>
    %68 = arith.addf %43, %67 : vector<8x128xf32>
    %69 = vector.extract_strided_slice %42 {offsets = [0, 8], sizes = [8, 8], strides = [1, 1]} : vector<8x384xf32> to vector<8x8xf32>
    %70 = vector.shape_cast %69 : vector<8x8xf32> to vector<1x8x8xf32>
    %71 = vector.extract_strided_slice %42 {offsets = [0, 136], sizes = [8, 8], strides = [1, 1]} : vector<8x384xf32> to vector<8x8xf32>
    %72 = vector.shape_cast %71 : vector<8x8xf32> to vector<1x8x8xf32>
    %73 = vector.extract_strided_slice %42 {offsets = [0, 264], sizes = [8, 8], strides = [1, 1]} : vector<8x384xf32> to vector<8x8xf32>
    %74 = vector.shape_cast %73 : vector<8x8xf32> to vector<1x8x8xf32>
    "tpu.trace_start"() <{level = 10 : i32, message = "bqc,bkc->bqk"}> : () -> ()
    %cst_30 = arith.constant dense<0.000000e+00> : vector<1x8x8xf32>
    %75 = tpu.matmul %70, %72, %cst_30 {dimension_numbers = #tpu.dot_dimension_numbers<[2], [2], [1], [1], [0, 0, 0, 1, 1, 1], [0], [0]>} : vector<1x8x8xf32>, vector<1x8x8xf32>, vector<1x8x8xf32> -> vector<1x8x8xf32>
    "tpu.trace_stop"() : () -> ()
    %cst_31 = arith.constant 0.353553385 : f32
    %76 = vector.broadcast %cst_31 : f32 to vector<1x8x8xf32>
    %77 = arith.mulf %75, %76 : vector<1x8x8xf32>
    %cst_32 = arith.constant dense<0xFF800000> : vector<1x8xf32>
    %78 = vector.multi_reduction <maximumf>, %77, %cst_32 [2] : vector<1x8x8xf32> to vector<1x8xf32>
    %79 = vector.shape_cast %78 : vector<1x8xf32> to vector<1x8x1xf32>
    %80 = vector.broadcast %79 : vector<1x8x1xf32> to vector<1x8x8xf32>
    %81 = arith.subf %77, %80 : vector<1x8x8xf32>
    %82 = math.exp %81 : vector<1x8x8xf32>
    %cst_33 = arith.constant dense<0.000000e+00> : vector<1x8xf32>
    %83 = vector.multi_reduction <add>, %82, %cst_33 [2] : vector<1x8x8xf32> to vector<1x8xf32>
    %84 = vector.shape_cast %83 : vector<1x8xf32> to vector<1x8x1xf32>
    %85 = tpu.reciprocal %84 : vector<1x8x1xf32> -> vector<1x8x1xf32>
    %86 = vector.broadcast %85 : vector<1x8x1xf32> to vector<1x8x8xf32>
    %87 = arith.mulf %82, %86 : vector<1x8x8xf32>
    "tpu.trace_start"() <{level = 10 : i32, message = "bqk,bkc->bqc"}> : () -> ()
    %cst_34 = arith.constant dense<0.000000e+00> : vector<1x8x8xf32>
    %88 = tpu.matmul %87, %74, %cst_34 {dimension_numbers = #tpu.dot_dimension_numbers<[2], [1], [1], [2], [0, 0, 0, 1, 1, 2], [0], [0]>} : vector<1x8x8xf32>, vector<1x8x8xf32>, vector<1x8x8xf32> -> vector<1x8x8xf32>
    "tpu.trace_stop"() : () -> ()
    %89 = vector.shape_cast %88 : vector<1x8x8xf32> to vector<8x8xf32>
    %c0_35 = arith.constant 0 : index
    %c1 = arith.constant 1 : index
    %c0_36 = arith.constant 0 : index
    %c0_37 = arith.constant 0 : index
    %90 = vector.load %arg5[%c0_35, %c1, %c0_36, %c0_37] : memref<1x4x8x128xf32, #tpu.memory_space<vmem>>, vector<1x1x8x128xf32>
    %91 = vector.shape_cast %90 : vector<1x1x8x128xf32> to vector<8x128xf32>
    %cst_38 = arith.constant dense<0.000000e+00> : vector<8x128xf32>
    %92 = tpu.matmul %89, %91, %cst_38 {dimension_numbers = #tpu.dot_dimension_numbers<[1], [0], [0], [1], [0, 0, 1, 1], [], []>} : vector<8x8xf32>, vector<8x128xf32>, vector<8x128xf32> -> vector<8x128xf32>
    %93 = arith.addf %68, %92 : vector<8x128xf32>
    %94 = vector.extract_strided_slice %42 {offsets = [0, 16], sizes = [8, 8], strides = [1, 1]} : vector<8x384xf32> to vector<8x8xf32>
    %95 = vector.shape_cast %94 : vector<8x8xf32> to vector<1x8x8xf32>
    %96 = vector.extract_strided_slice %42 {offsets = [0, 144], sizes = [8, 8], strides = [1, 1]} : vector<8x384xf32> to vector<8x8xf32>
    %97 = vector.shape_cast %96 : vector<8x8xf32> to vector<1x8x8xf32>
    %98 = vector.extract_strided_slice %42 {offsets = [0, 272], sizes = [8, 8], strides = [1, 1]} : vector<8x384xf32> to vector<8x8xf32>
    %99 = vector.shape_cast %98 : vector<8x8xf32> to vector<1x8x8xf32>
    "tpu.trace_start"() <{level = 10 : i32, message = "bqc,bkc->bqk"}> : () -> ()
    %cst_39 = arith.constant dense<0.000000e+00> : vector<1x8x8xf32>
    %100 = tpu.matmul %95, %97, %cst_39 {dimension_numbers = #tpu.dot_dimension_numbers<[2], [2], [1], [1], [0, 0, 0, 1, 1, 1], [0], [0]>} : vector<1x8x8xf32>, vector<1x8x8xf32>, vector<1x8x8xf32> -> vector<1x8x8xf32>
    "tpu.trace_stop"() : () -> ()
    %cst_40 = arith.constant 0.353553385 : f32
    %101 = vector.broadcast %cst_40 : f32 to vector<1x8x8xf32>
    %102 = arith.mulf %100, %101 : vector<1x8x8xf32>
    %cst_41 = arith.constant dense<0xFF800000> : vector<1x8xf32>
    %103 = vector.multi_reduction <maximumf>, %102, %cst_41 [2] : vector<1x8x8xf32> to vector<1x8xf32>
    %104 = vector.shape_cast %103 : vector<1x8xf32> to vector<1x8x1xf32>
    %105 = vector.broadcast %104 : vector<1x8x1xf32> to vector<1x8x8xf32>
    %106 = arith.subf %102, %105 : vector<1x8x8xf32>
    %107 = math.exp %106 : vector<1x8x8xf32>
    %cst_42 = arith.constant dense<0.000000e+00> : vector<1x8xf32>
    %108 = vector.multi_reduction <add>, %107, %cst_42 [2] : vector<1x8x8xf32> to vector<1x8xf32>
    %109 = vector.shape_cast %108 : vector<1x8xf32> to vector<1x8x1xf32>
    %110 = tpu.reciprocal %109 : vector<1x8x1xf32> -> vector<1x8x1xf32>
    %111 = vector.broadcast %110 : vector<1x8x1xf32> to vector<1x8x8xf32>
    %112 = arith.mulf %107, %111 : vector<1x8x8xf32>
    "tpu.trace_start"() <{level = 10 : i32, message = "bqk,bkc->bqc"}> : () -> ()
    %cst_43 = arith.constant dense<0.000000e+00> : vector<1x8x8xf32>
    %113 = tpu.matmul %112, %99, %cst_43 {dimension_numbers = #tpu.dot_dimension_numbers<[2], [1], [1], [2], [0, 0, 0, 1, 1, 2], [0], [0]>} : vector<1x8x8xf32>, vector<1x8x8xf32>, vector<1x8x8xf32> -> vector<1x8x8xf32>
    "tpu.trace_stop"() : () -> ()
    %114 = vector.shape_cast %113 : vector<1x8x8xf32> to vector<8x8xf32>
    %c0_44 = arith.constant 0 : index
    %c2 = arith.constant 2 : index
    %c0_45 = arith.constant 0 : index
    %c0_46 = arith.constant 0 : index
    %115 = vector.load %arg5[%c0_44, %c2, %c0_45, %c0_46] : memref<1x4x8x128xf32, #tpu.memory_space<vmem>>, vector<1x1x8x128xf32>
    %116 = vector.shape_cast %115 : vector<1x1x8x128xf32> to vector<8x128xf32>
    %cst_47 = arith.constant dense<0.000000e+00> : vector<8x128xf32>
    %117 = tpu.matmul %114, %116, %cst_47 {dimension_numbers = #tpu.dot_dimension_numbers<[1], [0], [0], [1], [0, 0, 1, 1], [], []>} : vector<8x8xf32>, vector<8x128xf32>, vector<8x128xf32> -> vector<8x128xf32>
    %118 = arith.addf %93, %117 : vector<8x128xf32>
    %119 = vector.extract_strided_slice %42 {offsets = [0, 24], sizes = [8, 8], strides = [1, 1]} : vector<8x384xf32> to vector<8x8xf32>
    %120 = vector.shape_cast %119 : vector<8x8xf32> to vector<1x8x8xf32>
    %121 = vector.extract_strided_slice %42 {offsets = [0, 152], sizes = [8, 8], strides = [1, 1]} : vector<8x384xf32> to vector<8x8xf32>
    %122 = vector.shape_cast %121 : vector<8x8xf32> to vector<1x8x8xf32>
    %123 = vector.extract_strided_slice %42 {offsets = [0, 280], sizes = [8, 8], strides = [1, 1]} : vector<8x384xf32> to vector<8x8xf32>
    %124 = vector.shape_cast %123 : vector<8x8xf32> to vector<1x8x8xf32>
    "tpu.trace_start"() <{level = 10 : i32, message = "bqc,bkc->bqk"}> : () -> ()
    %cst_48 = arith.constant dense<0.000000e+00> : vector<1x8x8xf32>
    %125 = tpu.matmul %120, %122, %cst_48 {dimension_numbers = #tpu.dot_dimension_numbers<[2], [2], [1], [1], [0, 0, 0, 1, 1, 1], [0], [0]>} : vector<1x8x8xf32>, vector<1x8x8xf32>, vector<1x8x8xf32> -> vector<1x8x8xf32>
    "tpu.trace_stop"() : () -> ()
    %cst_49 = arith.constant 0.353553385 : f32
    %126 = vector.broadcast %cst_49 : f32 to vector<1x8x8xf32>
    %127 = arith.mulf %125, %126 : vector<1x8x8xf32>
    %cst_50 = arith.constant dense<0xFF800000> : vector<1x8xf32>
    %128 = vector.multi_reduction <maximumf>, %127, %cst_50 [2] : vector<1x8x8xf32> to vector<1x8xf32>
    %129 = vector.shape_cast %128 : vector<1x8xf32> to vector<1x8x1xf32>
    %130 = vector.broadcast %129 : vector<1x8x1xf32> to vector<1x8x8xf32>
    %131 = arith.subf %127, %130 : vector<1x8x8xf32>
    %132 = math.exp %131 : vector<1x8x8xf32>
    %cst_51 = arith.constant dense<0.000000e+00> : vector<1x8xf32>
    %133 = vector.multi_reduction <add>, %132, %cst_51 [2] : vector<1x8x8xf32> to vector<1x8xf32>
    %134 = vector.shape_cast %133 : vector<1x8xf32> to vector<1x8x1xf32>
    %135 = tpu.reciprocal %134 : vector<1x8x1xf32> -> vector<1x8x1xf32>
    %136 = vector.broadcast %135 : vector<1x8x1xf32> to vector<1x8x8xf32>
    %137 = arith.mulf %132, %136 : vector<1x8x8xf32>
    "tpu.trace_start"() <{level = 10 : i32, message = "bqk,bkc->bqc"}> : () -> ()
    %cst_52 = arith.constant dense<0.000000e+00> : vector<1x8x8xf32>
    %138 = tpu.matmul %137, %124, %cst_52 {dimension_numbers = #tpu.dot_dimension_numbers<[2], [1], [1], [2], [0, 0, 0, 1, 1, 2], [0], [0]>} : vector<1x8x8xf32>, vector<1x8x8xf32>, vector<1x8x8xf32> -> vector<1x8x8xf32>
    "tpu.trace_stop"() : () -> ()
    %139 = vector.shape_cast %138 : vector<1x8x8xf32> to vector<8x8xf32>
    %c0_53 = arith.constant 0 : index
    %c3 = arith.constant 3 : index
    %c0_54 = arith.constant 0 : index
    %c0_55 = arith.constant 0 : index
    %140 = vector.load %arg5[%c0_53, %c3, %c0_54, %c0_55] : memref<1x4x8x128xf32, #tpu.memory_space<vmem>>, vector<1x1x8x128xf32>
    %141 = vector.shape_cast %140 : vector<1x1x8x128xf32> to vector<8x128xf32>
    %cst_56 = arith.constant dense<0.000000e+00> : vector<8x128xf32>
    %142 = tpu.matmul %139, %141, %cst_56 {dimension_numbers = #tpu.dot_dimension_numbers<[1], [0], [0], [1], [0, 0, 1, 1], [], []>} : vector<8x8xf32>, vector<8x128xf32>, vector<8x128xf32> -> vector<8x128xf32>
    %143 = arith.addf %118, %142 : vector<8x128xf32>
    %144 = arith.addf %8, %143 : vector<8x128xf32>
    %c0_57 = arith.constant 0 : index
    %c0_58 = arith.constant 0 : index
    %c0_59 = arith.constant 0 : index
    %145 = vector.load %arg6[%c0_57, %c0_58, %c0_59] : memref<1x1x128xf32, #tpu.memory_space<vmem>>, vector<1x1x128xf32>
    %146 = vector.shape_cast %145 : vector<1x1x128xf32> to vector<1x128xf32>
    %147 = vector.broadcast %146 : vector<1x128xf32> to vector<8x128xf32>
    %148 = arith.addf %144, %147 : vector<8x128xf32>
    %c0_60 = arith.constant 0 : index
    %c0_61 = arith.constant 0 : index
    %c0_62 = arith.constant 0 : index
    %149 = vector.load %arg13[%c0_60, %c0_61, %c0_62] : memref<1x1x128xf32, #tpu.memory_space<vmem>>, vector<1x1x128xf32>
    %150 = vector.shape_cast %149 : vector<1x1x128xf32> to vector<1x128xf32>
    %c0_63 = arith.constant 0 : index
    %c0_64 = arith.constant 0 : index
    %c0_65 = arith.constant 0 : index
    %151 = vector.load %arg14[%c0_63, %c0_64, %c0_65] : memref<1x1x128xf32, #tpu.memory_space<vmem>>, vector<1x1x128xf32>
    %152 = vector.shape_cast %151 : vector<1x1x128xf32> to vector<1x128xf32>
    %cst_66 = arith.constant dense<0.000000e+00> : vector<8xf32>
    %153 = vector.multi_reduction <add>, %148, %cst_66 [1] : vector<8x128xf32> to vector<8xf32>
    %154 = vector.shape_cast %153 : vector<8xf32> to vector<8x1xf32>
    %cst_67 = arith.constant 3.125000e-02 : f32
    %155 = vector.broadcast %cst_67 : f32 to vector<8x1xf32>
    %156 = arith.mulf %154, %155 : vector<8x1xf32>
    %157 = vector.broadcast %156 : vector<8x1xf32> to vector<8x128xf32>
    %158 = arith.subf %148, %157 : vector<8x128xf32>
    %159 = vector.broadcast %4 : vector<1x128xf32> to vector<8x128xf32>
    %160 = arith.mulf %158, %159 : vector<8x128xf32>
    %161 = arith.mulf %160, %160 : vector<8x128xf32>
    %cst_68 = arith.constant dense<0.000000e+00> : vector<8xf32>
    %162 = vector.multi_reduction <add>, %161, %cst_68 [1] : vector<8x128xf32> to vector<8xf32>
    %163 = vector.shape_cast %162 : vector<8xf32> to vector<8x1xf32>
    %cst_69 = arith.constant 0.0322580636 : f32
    %164 = vector.broadcast %cst_69 : f32 to vector<8x1xf32>
    %165 = arith.mulf %163, %164 : vector<8x1xf32>
    %166 = math.sqrt %165 : vector<8x1xf32>
    %cst_70 = arith.constant 9.99999997E-7 : f32
    %167 = vector.broadcast %cst_70 : f32 to vector<8x1xf32>
    %168 = arith.addf %166, %167 : vector<8x1xf32>
    %169 = tpu.reciprocal %168 : vector<8x1xf32> -> vector<8x1xf32>
    %170 = vector.broadcast %169 : vector<8x1xf32> to vector<8x128xf32>
    %171 = arith.mulf %160, %170 : vector<8x128xf32>
    %172 = vector.broadcast %150 : vector<1x128xf32> to vector<8x128xf32>
    %173 = arith.mulf %172, %171 : vector<8x128xf32>
    %174 = vector.broadcast %152 : vector<1x128xf32> to vector<8x128xf32>
    %175 = arith.addf %173, %174 : vector<8x128xf32>
    %c0_71 = arith.constant 0 : index
    %c0_72 = arith.constant 0 : index
    %c0_73 = arith.constant 0 : index
    %176 = vector.load %arg7[%c0_71, %c0_72, %c0_73] : memref<1x128x128xf32, #tpu.memory_space<vmem>>, vector<1x128x128xf32>
    %177 = vector.shape_cast %176 : vector<1x128x128xf32> to vector<128x128xf32>
    %cst_74 = arith.constant dense<0.000000e+00> : vector<8x128xf32>
    %178 = tpu.matmul %175, %177, %cst_74 {dimension_numbers = #tpu.dot_dimension_numbers<[1], [0], [0], [1], [0, 0, 1, 1], [], []>} : vector<8x128xf32>, vector<128x128xf32>, vector<8x128xf32> -> vector<8x128xf32>
    %c0_75 = arith.constant 0 : index
    %c0_76 = arith.constant 0 : index
    %c0_77 = arith.constant 0 : index
    %179 = vector.load %arg8[%c0_75, %c0_76, %c0_77] : memref<1x1x128xf32, #tpu.memory_space<vmem>>, vector<1x1x128xf32>
    %180 = vector.shape_cast %179 : vector<1x1x128xf32> to vector<1x128xf32>
    %181 = vector.broadcast %180 : vector<1x128xf32> to vector<8x128xf32>
    %182 = arith.addf %178, %181 : vector<8x128xf32>
    %cst_78 = arith.constant 0.000000e+00 : f32
    %183 = vector.broadcast %cst_78 : f32 to vector<8x128xf32>
    %184 = arith.maximumf %182, %183 : vector<8x128xf32>
    %c0_79 = arith.constant 0 : index
    %c0_80 = arith.constant 0 : index
    %c0_81 = arith.constant 0 : index
    %185 = vector.load %arg9[%c0_79, %c0_80, %c0_81] : memref<1x128x128xf32, #tpu.memory_space<vmem>>, vector<1x128x128xf32>
    %186 = vector.shape_cast %185 : vector<1x128x128xf32> to vector<128x128xf32>
    %cst_82 = arith.constant dense<0.000000e+00> : vector<8x128xf32>
    %187 = tpu.matmul %184, %186, %cst_82 {dimension_numbers = #tpu.dot_dimension_numbers<[1], [0], [0], [1], [0, 0, 1, 1], [], []>} : vector<8x128xf32>, vector<128x128xf32>, vector<8x128xf32> -> vector<8x128xf32>
    %c0_83 = arith.constant 0 : index
    %c0_84 = arith.constant 0 : index
    %c0_85 = arith.constant 0 : index
    %188 = vector.load %arg10[%c0_83, %c0_84, %c0_85] : memref<1x1x128xf32, #tpu.memory_space<vmem>>, vector<1x1x128xf32>
    %189 = vector.shape_cast %188 : vector<1x1x128xf32> to vector<1x128xf32>
    %190 = vector.broadcast %189 : vector<1x128xf32> to vector<8x128xf32>
    %191 = arith.addf %187, %190 : vector<8x128xf32>
    %192 = arith.addf %148, %191 : vector<8x128xf32>
    %c1_i32 = arith.constant 1 : i32
    %193 = arith.cmpi slt, %arg1, %c1_i32 : i32
    %194 = arith.extui %193 : i1 to i32
    %c0_i32_86 = arith.constant 0 : i32
    %195 = arith.cmpi ne, %194, %c0_i32_86 : i32
    scf.if %195 {
      %c0_89 = arith.constant 0 : index
      %c0_90 = arith.constant 0 : index
      %199 = vector.load %arg18[%c0_89, %c0_90] : memref<8x128xf32, #tpu.memory_space<vmem>>, vector<8x128xf32>
      tpu.vector_store %arg18[%c0_89, %c0_90], %192 {strides = array<i32>} : memref<8x128xf32, #tpu.memory_space<vmem>>, vector<8x128xf32>,
    } else {
    }
    %c1_i32_87 = arith.constant 1 : i32
    %196 = arith.cmpi eq, %arg1, %c1_i32_87 : i32
    %197 = arith.extui %196 : i1 to i32
    %c0_i32_88 = arith.constant 0 : i32
    %198 = arith.cmpi ne, %197, %c0_i32_88 : i32
    scf.if %198 {
      %c0_89 = arith.constant 0 : index
      %c0_90 = arith.constant 0 : index
      %199 = vector.load %arg15[%c0_89, %c0_90] : memref<1x128xf32, #tpu.memory_space<vmem>>, vector<1x128xf32>
      %c0_91 = arith.constant 0 : index
      %c0_92 = arith.constant 0 : index
      %200 = vector.load %arg16[%c0_91, %c0_92] : memref<1x128xf32, #tpu.memory_space<vmem>>, vector<1x128xf32>
      %cst_93 = arith.constant dense<0.000000e+00> : vector<8xf32>
      %201 = vector.multi_reduction <add>, %192, %cst_93 [1] : vector<8x128xf32> to vector<8xf32>
      %202 = vector.shape_cast %201 : vector<8xf32> to vector<8x1xf32>
      %cst_94 = arith.constant 3.125000e-02 : f32
      %203 = vector.broadcast %cst_94 : f32 to vector<8x1xf32>
      %204 = arith.mulf %202, %203 : vector<8x1xf32>
      %205 = vector.broadcast %204 : vector<8x1xf32> to vector<8x128xf32>
      %206 = arith.subf %192, %205 : vector<8x128xf32>
      %207 = vector.broadcast %4 : vector<1x128xf32> to vector<8x128xf32>
      %208 = arith.mulf %206, %207 : vector<8x128xf32>
      %209 = arith.mulf %208, %208 : vector<8x128xf32>
      %cst_95 = arith.constant dense<0.000000e+00> : vector<8xf32>
      %210 = vector.multi_reduction <add>, %209, %cst_95 [1] : vector<8x128xf32> to vector<8xf32>
      %211 = vector.shape_cast %210 : vector<8xf32> to vector<8x1xf32>
      %cst_96 = arith.constant 0.0322580636 : f32
      %212 = vector.broadcast %cst_96 : f32 to vector<8x1xf32>
      %213 = arith.mulf %211, %212 : vector<8x1xf32>
      %214 = math.sqrt %213 : vector<8x1xf32>
      %cst_97 = arith.constant 9.99999997E-7 : f32
      %215 = vector.broadcast %cst_97 : f32 to vector<8x1xf32>
      %216 = arith.addf %214, %215 : vector<8x1xf32>
      %217 = tpu.reciprocal %216 : vector<8x1xf32> -> vector<8x1xf32>
      %218 = vector.broadcast %217 : vector<8x1xf32> to vector<8x128xf32>
      %219 = arith.mulf %208, %218 : vector<8x128xf32>
      %220 = vector.broadcast %199 : vector<1x128xf32> to vector<8x128xf32>
      %221 = arith.mulf %220, %219 : vector<8x128xf32>
      %222 = vector.broadcast %200 : vector<1x128xf32> to vector<8x128xf32>
      %223 = arith.addf %221, %222 : vector<8x128xf32>
      %224 = vector.shape_cast %223 : vector<8x128xf32> to vector<1x8x128xf32>
      %c0_98 = arith.constant 0 : index
      %c0_99 = arith.constant 0 : index
      %c0_100 = arith.constant 0 : index
      %225 = vector.load %arg17[%c0_98, %c0_99, %c0_100] : memref<1x8x128xf32, #tpu.memory_space<vmem>>, vector<1x8x128xf32>
      tpu.vector_store %arg17[%c0_98, %c0_99, %c0_100], %224 {strides = array<i32>} : memref<1x8x128xf32, #tpu.memory_space<vmem>>, vector<1x8x128xf32>,
    } else {
    }
    return
  }
  func.func @transform_0(%arg0: i32, %arg1: i32) -> (i32, i32, i32) {
    %c0_i32 = arith.constant 0 : i32
    %c0_i32_0 = arith.constant 0 : i32
    %c0_i32_1 = arith.constant 0 : i32
    return %arg0, %c0_i32, %c0_i32_0 : i32, i32, i32
  }
  func.func @transform_1(%arg0: i32, %arg1: i32) -> (i32, i32, i32) {
    %c0_i32 = arith.constant 0 : i32
    %c0_i32_0 = arith.constant 0 : i32
    %c0_i32_1 = arith.constant 0 : i32
    return %arg1, %c0_i32, %c0_i32_0 : i32, i32, i32
  }
  func.func @transform_2(%arg0: i32, %arg1: i32) -> (i32, i32, i32) {
    %c0_i32 = arith.constant 0 : i32
    %c0_i32_0 = arith.constant 0 : i32
    %c0_i32_1 = arith.constant 0 : i32
    return %arg1, %c0_i32, %c0_i32_0 : i32, i32, i32
  }
  func.func @transform_3(%arg0: i32, %arg1: i32) -> (i32, i32, i32, i32) {
    %c0_i32 = arith.constant 0 : i32
    %c0_i32_0 = arith.constant 0 : i32
    %c0_i32_1 = arith.constant 0 : i32
    %c0_i32_2 = arith.constant 0 : i32
    return %arg1, %c0_i32, %c0_i32_0, %c0_i32_1 : i32, i32, i32, i32
  }
  func.func @transform_4(%arg0: i32, %arg1: i32) -> (i32, i32, i32) {
    %c0_i32 = arith.constant 0 : i32
    %c0_i32_0 = arith.constant 0 : i32
    %c0_i32_1 = arith.constant 0 : i32
    return %arg1, %c0_i32, %c0_i32_0 : i32, i32, i32
  }
  func.func @transform_5(%arg0: i32, %arg1: i32) -> (i32, i32, i32) {
    %c0_i32 = arith.constant 0 : i32
    %c0_i32_0 = arith.constant 0 : i32
    %c0_i32_1 = arith.constant 0 : i32
    return %arg1, %c0_i32, %c0_i32_0 : i32, i32, i32
  }
  func.func @transform_6(%arg0: i32, %arg1: i32) -> (i32, i32, i32) {
    %c0_i32 = arith.constant 0 : i32
    %c0_i32_0 = arith.constant 0 : i32
    %c0_i32_1 = arith.constant 0 : i32
    return %arg1, %c0_i32, %c0_i32_0 : i32, i32, i32
  }
  func.func @transform_7(%arg0: i32, %arg1: i32) -> (i32, i32, i32) {
    %c0_i32 = arith.constant 0 : i32
    %c0_i32_0 = arith.constant 0 : i32
    %c0_i32_1 = arith.constant 0 : i32
    return %arg1, %c0_i32, %c0_i32_0 : i32, i32, i32
  }
  func.func @transform_8(%arg0: i32, %arg1: i32) -> (i32, i32, i32) {
    %c0_i32 = arith.constant 0 : i32
    %c0_i32_0 = arith.constant 0 : i32
    %c0_i32_1 = arith.constant 0 : i32
    return %arg1, %c0_i32, %c0_i32_0 : i32, i32, i32
  }
  func.func @transform_9(%arg0: i32, %arg1: i32) -> (i32, i32, i32) {
    %c0_i32 = arith.constant 0 : i32
    %c0_i32_0 = arith.constant 0 : i32
    %c0_i32_1 = arith.constant 0 : i32
    return %arg1, %c0_i32, %c0_i32_0 : i32, i32, i32
  }
  func.func @transform_10(%arg0: i32, %arg1: i32) -> (i32, i32, i32) {
    %c0_i32 = arith.constant 0 : i32
    %c0_i32_0 = arith.constant 0 : i32
    %c0_i32_1 = arith.constant 0 : i32
    return %arg1, %c0_i32, %c0_i32_0 : i32, i32, i32
  }
  func.func @transform_11(%arg0: i32, %arg1: i32) -> (i32, i32, i32) {
    %c0_i32 = arith.constant 0 : i32
    %c0_i32_0 = arith.constant 0 : i32
    %c0_i32_1 = arith.constant 0 : i32
    return %arg1, %c0_i32, %c0_i32_0 : i32, i32, i32
  }
  func.func @transform_12(%arg0: i32, %arg1: i32) -> (i32, i32, i32) {
    %c0_i32 = arith.constant 0 : i32
    %c0_i32_0 = arith.constant 0 : i32
    %c0_i32_1 = arith.constant 0 : i32
    return %arg1, %c0_i32, %c0_i32_0 : i32, i32, i32
  }
  func.func @transform_13(%arg0: i32, %arg1: i32) -> (i32, i32) {
    %c0_i32 = arith.constant 0 : i32
    %c0_i32_0 = arith.constant 0 : i32
    %c0_i32_1 = arith.constant 0 : i32
    return %c0_i32, %c0_i32_0 : i32, i32
  }
  func.func @transform_14(%arg0: i32, %arg1: i32) -> (i32, i32) {
    %c0_i32 = arith.constant 0 : i32
    %c0_i32_0 = arith.constant 0 : i32
    %c0_i32_1 = arith.constant 0 : i32
    return %c0_i32, %c0_i32_0 : i32, i32
  }
  func.func @transform_15(%arg0: i32, %arg1: i32) -> (i32, i32, i32) {
    %c0_i32 = arith.constant 0 : i32
    %c0_i32_0 = arith.constant 0 : i32
    %c0_i32_1 = arith.constant 0 : i32
    return %arg0, %c0_i32, %c0_i32_0 : i32, i32, i32
  }
}

</mosaic_0001>

<bundles_post_ra>
// kernel: tpu_custom_call.1
= control target key start
LH: loop header
LB: loop body
LE: loop exit
PB: predicated region body
PF: predicated region fallthrough
CT: control target
= control target key end

     0   :  { %s4248_s0 = inlined_call_operand.hbm [shape: f32[2,8,128], index: 0, kind: input, shape index: {}]   ;;  %s4249_s1 = inlined_call_operand.hbm [shape: f32[2,128,384], index: 1, kind: input, shape index: {}]   ;;  %s4250_s2 = inlined_call_operand.vmem [shape: f32[2,1,384], index: 2, kind: input, shape index: {}]   ;;  %s4251_s3 = inlined_call_operand.hbm [shape: f32[2,4,8,128], index: 3, kind: input, shape index: {}]   ;;  %s4252_s4 = inlined_call_operand.vmem [shape: f32[2,1,128], index: 4, kind: input, shape index: {}]   ;;  %s4253_s5 = inlined_call_operand.hbm [shape: f32[2,128,128], index: 5, kind: input, shape index: {}]   ;;  %s4254_s6 = inlined_call_operand.vmem [shape: f32[2,1,128], index: 6, kind: input, shape index: {}]   ;;  %s4255_s7 = inlined_call_operand.hbm [shape: f32[2,128,128], index: 7, kind: input, shape index: {}]   ;;  %s4256_s8 = inlined_call_operand.vmem [shape: f32[2,1,128], index: 8, kind: input, shape index: {}]   ;;  %s4257_s9 = inlined_call_operand.vmem [shape: f32[2,1,128], index: 9, kind: input, shape index: {}]   ;;  %s4258_s10 = inlined_call_operand.vmem [shape: f32[2,1,128], index: 10, kind: input, shape index: {}]   ;;  %s4259_s11 = inlined_call_operand.vmem [shape: f32[2,1,128], index: 11, kind: input, shape index: {}]   ;;  %s4260_s12 = inlined_call_operand.vmem [shape: f32[2,1,128], index: 12, kind: input, shape index: {}]   ;;  %s4261_s13 = inlined_call_operand.vmem [shape: f32[1,128], index: 13, kind: input, shape index: {}]   ;;  %s4262_s14 = inlined_call_operand.vmem [shape: f32[1,128], index: 14, kind: input, shape index: {}]   ;;  %s4263_s15 = inlined_call_operand.hbm [shape: f32[2,8,128], index: 15, kind: output, shape index: {}]  }
   0x1   :  { %4296 = sst [smem:[#allocation35_spill]] %s4248_s0 }
   0x2   :  { %4297 = sst [smem:[#allocation36_spill]] %s4249_s1 }
   0x3   :  { %4298 = sst [smem:[#allocation37_spill]] %s4250_s2 }
   0x4   :  { %4299 = sst [smem:[#allocation38_spill]] %s4251_s3 }
   0x5   :  { %4300 = sst [smem:[#allocation39_spill]] %s4252_s4 }
   0x6   :  { %4301 = sst [smem:[#allocation40_spill]] %s4253_s5 }
   0x7   :  { %4302 = sst [smem:[#allocation41_spill]] %s4254_s6 }
   0x8   :  { %4303 = sst [smem:[#allocation42_spill]] %s4255_s7 }
   0x9   :  { %4304 = sst [smem:[#allocation43_spill]] %s4256_s8 }
   0xa   :  { %4305 = sst [smem:[#allocation44_spill]] %s4257_s9 }
   0xb   :  { %4306 = sst [smem:[#allocation45_spill]] %s4258_s10 }
   0xc   :  { %4307 = sst [smem:[#allocation46_spill]] %s4259_s11 }
   0xd   :  { %4308 = sst [smem:[#allocation47_spill]] %s4260_s12 }
   0xe   :  { %4309 = sst [smem:[#allocation48_spill]] %s4261_s13 }
   0xf   :  { %4310 = sst [smem:[#allocation49_spill]] %s4262_s14 }
  0x10   :  { %4311 = sst [smem:[#allocation50_spill]] %s4263_s15 }
  0x11   :  { %20 = vsyncpa [#allocation4], 0 }
  0x12   :  { %22 = vsyncpa [#allocation4 + $0x1], 0 }
  0x13   :  { %23 = vsyncpa [#allocation7], 0 }
  0x14   :  { %25 = vsyncpa [#allocation7 + $0x1], 0 }
  0x15   :  { %26 = vsyncpa [#allocation10], 0 }
  0x16   :  { %28 = vsyncpa [#allocation10 + $0x1], 0 }
  0x17   :  { %29 = vsyncpa [#allocation5], 0 }
  0x18   :  { %31 = vsyncpa [#allocation5 + $0x1], 0  ;;  %s3486_s18 = smov 0   ;;  %s3488_s19 = smov 0  }
  0x19   :  { %s3490_s20 = smov 0   ;;  %s3492_s21 = smov 0  }
  0x1a   :  { %s3494_s22 = smov 0   ;;  %s3496_s23 = smov 0  }
  0x1b   :  { %s3498_s24 = smov 0   ;;  %s3500_s25 = smov 0  }
  0x1c   :  { %s3502_s26 = smov 0   ;;  %s3504_s27 = smov 0  }
  0x1d   :  { %s3506_s28 = smov 0  }
  0x1e LB: > { %4312 = sst [smem:[#allocation17_spill]] %s3352_s19  ;;  %p4266_p0 = scmp.eq.s32.totalorder %s3388_s28, 0  ;;  %s3388_s28 = sphi %s3506_s28, %s37_s28   ;;  %s3384_s27 = sphi %s3504_s27, %s4401_s27   ;;  %s3380_s26 = sphi %s3502_s26, %s4400_s26   ;;  %s3376_s25 = sphi %s3500_s25, %s4399_s25   ;;  %s3372_s24 = sphi %s3498_s24, %s4398_s24   ;;  %s3368_s23 = sphi %s3496_s23, %s4397_s23   ;;  %s3364_s22 = sphi %s3494_s22, %s4396_s22   ;;  %s3360_s21 = sphi %s3492_s21, %s4395_s21   ;;  %s3356_s20 = sphi %s3490_s20, %s4394_s20   ;;  %s3352_s19 = sphi %s3488_s19, %s4393_s19   ;;  %s3348_s18 = sphi %s3486_s18, %s4392_s18  }
  0x1f   : > { %4313 = sst [smem:[#allocation18_spill]] %s3356_s20  ;;  %p89_p1 = scmp.ne.s32.totalorder %s3356_s20, %s3352_s19 }
  0x20   : > { %4314 = sst [smem:[#allocation19_spill]] %s3360_s21  ;;  %p4265_p2 = scmp.lt.s32.totalorder %s3388_s28, 4 }
  0x21   : > { %4315 = sst [smem:[#allocation20_spill]] %s3364_s22  ;;  %p91_p3 = por %p89_p1, %p4266_p0 }
  0x22   : > { %4316 = sst [smem:[#allocation21_spill]] %s3368_s23  ;;  %s3550_s16 = sand.u32 1, %s3356_s20  }
  0x23   : > { %4317 = sst [smem:[#allocation22_spill]] %s3372_s24  ;;  %s2945_s17 = smul.u32 6144, %s3380_s26 }
  0x24   : > { %4318 = sst [smem:[#allocation23_spill]] %s3376_s25  ;;  %s2944_s15 = smul.u32 384, %s3550_s16 }
  0x25   : > { %4319 = sst [smem:[#allocation24_spill]] %s3380_s26  ;;  %p3556_p4 = pnand %p4265_p2, %p91_p3 }
  0x26   : > { %4320 = sst [smem:[#allocation25_spill]] %s3384_s27  ;;  %s4323_s1 = sld [smem:[#allocation36_spill]] }
  0x27   : > { %4321 = sst [smem:[#allocation26_spill]] %s3388_s28  ;;  %s501_s30 = scalar_lea.vmem [#allocation6], %s2944_s15 }
  0x28   : > { %s4322_s25 = scalar_select %p3556_p4, 1, 0 }
  0x29   : > { %s508_s12 = sshll.u32 %s501_s30, 4  ;;  %s4324_s11 = sand.u32 1, %s3388_s28   ;;  %s3565_s12 = int_to_ptr.vmem [resolvable:$true] %s508_s12 }
  0x2a   : > { %s3570_s10 = scalar_lea.sflag [#allocation7], %s4324_s11  ;;  %p3576_p7 = pneg %p3556_p4 }
  0x2c   : > { %s3563_s29 = scalar_lea.hbm %s4323_s1, %s2945_s17  ;;  %s3113_s30 = scalar_lea.hbm %s4323_s1, 12288 }
  0x2d   : > { %s3108_s9 = scalar_lea.hbm %s3563_s29, 6144  ;;  %p3114_p10 = scmp.lt.u32.totalorder %s3563_s29, %s4323_s1 }
  0x2e   : > { %p3109_p6 = scmp.ne.s32.totalorder %s3563_s29, %s3108_s9  ;;  %p3115_p11 = scmp.lt.u32.totalorder %s3113_s30, %s3108_s9 }
  0x2f   : > { %p3117_p13 = scmp.lt.u32.totalorder %s3108_s9, %s3563_s29 }
  0x30   : > { %p3111_p8 = pnand %p3576_p7, %p3109_p6  ;;  %p3116_p12 = por %p3115_p11, %p3114_p10 }
  0x32   : > { %p3112_p9 = pneg %p3111_p8  ;;  %p3118_p1 = por %p3117_p13, %p3116_p12 }
  0x34   : > { %p3119_p3 = pnand %p3118_p1, %p3112_p9 }
  0x36   : > { %3122 = shalt.err (!%p3119_p3)
}
  0x37   : > { %s3123_s11 = scalar_lea.vmem %s3565_s12, 6144  ;;  %s3390_s14 = smov [#allocation6]  }
  0x38   : > { %p3124_p6 = scmp.ne.s32.totalorder %s3565_s12, %s3123_s11  ;;  %s3128_s15 = sshll.u32 %s3390_s14, 4  ;;  %s3129_s15 = int_to_ptr.vmem [resolvable:$false] %s3128_s15 }
  0x39   : > { %s3130_s2 = scalar_lea.vmem %s3129_s15, 12288  ;;  %p3131_p0 = scmp.lt.s32.totalorder %s3565_s12, %s3129_s15 }
  0x3a   : > { %p3126_p8 = pnand %p3124_p6, %p3576_p7  ;;  %p3132_p5 = scmp.lt.s32.totalorder %s3130_s2, %s3123_s11 }
  0x3c   : > { %p3127_p2 = pneg %p3126_p8  ;;  %p3133_p10 = por %p3132_p5, %p3131_p0 }
  0x3e   : > { %p3134_p11 = pnand %p3133_p10, %p3127_p2 }
  0x40   : > { %3137 = shalt.err (!%p3134_p11)
}
  0x41   : > { %s3391_s9 = smov 384   ;;  %s3392_s30 = smov 24  }
  0x42   : > { %2966 = dma.hbm_to_vmem [thread:$0]  (!%p3556_p4), %s3563_s29, 6144, %s3565_s12, %s3570_s10, %s3391_s9, %s3391_s9, %s3392_s30  }
  0x43   : > { %p628_p9 = scmp.lt.s32.totalorder %s3388_s28, 5  ;;  %p4326_p0 = scmp.ge.s32.totalorder %s3388_s28, 1 }
  0x44   : > { %s2549_s11 = sshll.u32 %s3550_s16, 7  ;;  %s4267_s14 = sshll.u32 %s3380_s26, 11 }
  0x45   : > { %p3603_p2 = pnand %p4326_p0, %p628_p9  ;;  %s4328_s5 = sld [smem:[#allocation40_spill]] }
  0x46   : > { %s556_s12 = scalar_lea.vmem [#allocation9], %s2549_s11  ;;  %s4329_s9 = sand.u32 1, %s3388_s28  }
  0x47   : > { %s4327_s17 = scalar_select %p3603_p2, 1, 0 }
  0x48   : > { %s563_s29 = sshll.u32 %s556_s12, 4  ;;  %s3622_s30 = scalar_lea.sflag [#allocation10], %s4329_s9  ;;  %s3618_s29 = int_to_ptr.vmem [resolvable:$true] %s563_s29 }
  0x4b   : > { %s3614_s1 = scalar_lea.hbm %s4328_s5, %s4267_s14  ;;  %s3143_s14 = scalar_lea.hbm %s4328_s5, 4096 }
  0x4c   : > { %s3138_s8 = scalar_lea.hbm %s3614_s1, 2048  ;;  %p3144_p1 = scmp.lt.u32.totalorder %s3614_s1, %s4328_s5 }
  0x4d   : > { %p3139_p5 = scmp.ne.s32.totalorder %s3614_s1, %s3138_s8  ;;  %p3145_p3 = scmp.lt.u32.totalorder %s3143_s14, %s3138_s8 }
  0x4e   : > { %p3147_p8 = scmp.lt.u32.totalorder %s3138_s8, %s3614_s1 }
  0x4f   : > { %p3141_p12 = pnand %p3139_p5, %p3576_p7  ;;  %p3146_p6 = por %p3145_p3, %p3144_p1 }
  0x51   : > { %p3142_p13 = pneg %p3141_p12  ;;  %p3148_p10 = por %p3147_p8, %p3146_p6 }
  0x53   : > { %p3149_p11 = pnand %p3148_p10, %p3142_p13 }
  0x55   : > { %3152 = shalt.err (!%p3149_p11)
}
  0x56   : > { %s3153_s12 = scalar_lea.vmem %s3618_s29, 2048  ;;  %s3393_s9 = smov [#allocation9]  }
  0x57   : > { %p3154_p9 = scmp.ne.s32.totalorder %s3618_s29, %s3153_s12  ;;  %s3158_s15 = sshll.u32 %s3393_s9, 4  ;;  %s3159_s15 = int_to_ptr.vmem [resolvable:$false] %s3158_s15 }
  0x58   : > { %s3160_s4 = scalar_lea.vmem %s3159_s15, 4096  ;;  %p3161_p12 = scmp.lt.s32.totalorder %s3618_s29, %s3159_s15 }
  0x59   : > { %p3156_p0 = pnand %p3154_p9, %p3576_p7  ;;  %p3162_p2 = scmp.lt.s32.totalorder %s3160_s4, %s3153_s12 }
  0x5b   : > { %p3157_p5 = pneg %p3156_p0  ;;  %p3163_p1 = por %p3162_p2, %p3161_p12 }
  0x5d   : > { %p3164_p3 = pnand %p3163_p1, %p3157_p5 }
  0x5f   : > { %3167 = shalt.err (!%p3164_p3)
}
  0x60   : > { %s4268_s6 = smov 128   ;;  %s4270_s8 = smov 8  }
  0x61   : > { %2972 = dma.hbm_to_vmem [thread:$0]  (!%p3556_p4), %s3614_s1, 2048, %s3618_s29, %s3622_s30, %s4268_s6, %s4268_s6, %s4270_s8  }
  0x62   : > { %s4330_s14 = sshll.u32 %s3380_s26, 11  ;;  %s4331_s7 = sld [smem:[#allocation42_spill]] }
  0x63   : > { %s583_s15 = scalar_lea.vmem [#allocation11], %s2549_s11  ;;  %s3661_s5 = sadd.s32 4294967295, %s3388_s28  }
  0x64   : > { %s590_s4 = sshll.u32 %s583_s15, 4  ;;  %4332 = sst [smem:[#allocation27_spill]] %s3661_s5  ;;  %s3658_s4 = int_to_ptr.vmem [resolvable:$true] %s590_s4 }
  0x65   : > { %s2540_s1 = sadd.s32 4294967294, %s3388_s28   ;;  %s46_s29 = sadd.s32 1, %s3380_s26 }
  0x66   : > { %p47_p2 = scmp.ge.s32.totalorder %s46_s29, 2  ;;  %s49_s2 = sadd.s32 1, %s3384_s27 }
  0x67   : > { %p63_p13 = scmp.ne.s32.totalorder %s3368_s23, %s3364_s22  ;;  %p4334_p6 = scmp.eq.s32.totalorder %s3388_s28, 0 }
  0x68   : > { %s3654_s9 = scalar_lea.hbm %s4331_s7, %s4330_s14  ;;  %s56_s14 = sadd.s32 1, %s3368_s23 }
  0x69   : > { %s4403_s29 = smov (%p47_p2, %s46_s29), 0  ;;  %s4405_s2 = smov (!%p47_p2, %s49_s2), %s3384_s27 }
  0x6a   : > { %4333 = sst [smem:[#allocation28_spill]] %s4403_s29  ;;  %p3677_p8 = por %p4334_p6, %p63_p13 }
  0x6b   : > { %p69_p10 = scmp.ne.s32.totalorder %s3364_s22, %s3360_s21  ;;  %p51_p11 = scmp.ge.s32.totalorder %s4405_s2, 2 }
  0x6c   : > { %p70_p9 = scmp.eq.s32.totalorder %s3661_s5, 0  ;;  %s79_s12 = ssub.s32 %s3380_s26, %s4403_s29 }
  0x6d   : > { %p95_p0 = scmp.ne.s32.totalorder %s3352_s19, %s3348_s18  ;;  %s4407_s2 = smov (%p51_p11, %s4405_s2), 0 }
  0x6e   : > { %4336 = sst [smem:[#allocation29_spill]] %s4407_s2  ;;  %p3693_p5 = por %p70_p9, %p69_p10 }
  0x6f   : > { %p80_p12 = scmp.eq.s32.totalorder %s79_s12, 0  ;;  %s53_s6 = ssub.s32 %s3384_s27, %s4407_s2 }
  0x70   : > { %s4337_s15 = scalar_select %p3693_p5, 1, 0 }
  0x71   : > { %p3699_p1 = por %p95_p0, %p70_p9  ;;  %p54_p3 = scmp.eq.s32.totalorder %s53_s6, 0 }
  0x72   : > { %4338 = sst [smem:[#allocation30_spill]] %s4337_s15  ;;  %p447_p2 = scmp.eq.s32.totalorder %s3661_s5, 3 }
  0x73   : > { %s4339_s8 = scalar_select %p3699_p1, 1, 0 }
  0x74   : > { %s4341_s18 = sadd.s32 1, %s3356_s20  ;;  %p3715_p6 = por %p447_p2, %p63_p13 }
  0x75   : > { %4340 = sst [smem:[#allocation31_spill]] %s4339_s8  ;;  %p453_p11 = scmp.eq.s32.totalorder %s2540_s1, 3 }
  0x76   : > { %s3707_s29 = scalar_select %p80_p12, %s3356_s20, %s4341_s18  }
  0x77   : > { %s3710_s24 = scalar_select %p54_p3, %s3368_s23, %s56_s14  }
  0x78   : > { %4342 = sst [smem:[#allocation32_spill]] %s3707_s29  ;;  %s479_s12 = sand.u32 1, %s3368_s23  }
  0x79   : > { %4343 = sst [smem:[#allocation33_spill]] %s3710_s24  ;;  %s2544_s2 = sshll.u32 %s3384_s27, 7 }
  0x7a   : > { %s4344_s19 = scalar_select %p3715_p6, 1, 0 }
  0x7b   : > { %p3724_p9 = por %p453_p11, %p69_p10  ;;  %s2543_s6 = sshll.u32 %s479_s12, 3 }
  0x7c   : > { %s4347_s0 = sld [smem:[#allocation35_spill]]  ;;  %p4348_p0 = scmp.lt.s32.totalorder %s3388_s28, 4 }
  0x7d   : > { %s4345_s15 = scalar_select %p3724_p9, 1, 0 }
  0x7e   : > { %p3737_p13 = pnand %p4348_p0, %p3677_p8  ;;  %s483_s14 = scalar_lea.vmem [#allocation3], %s2543_s6 }
  0x7f   : > { %4346 = sst [smem:[#allocation34_spill]] %s4345_s15  ;;  %s490_s27 = sshll.u32 %s483_s14, 4  ;;  %s3742_s27 = int_to_ptr.vmem [resolvable:$true] %s490_s27 }
  0x80   : > { %s2546_s24 = sshll.u32 %s3550_s16, 5  ;;  %s480_s5 = scalar_lea.sflag [#allocation4], %s479_s12 }
  0x81   : > { %p3170_p12 = pneg %p3737_p13 }
  0x82   : > { %s3731_s18 = scalar_lea.hbm %s4347_s0, %s2544_s2  ;;  %s3173_s23 = scalar_lea.hbm %s4347_s0, 256 }
  0x83   : > { %s3168_s8 = scalar_lea.hbm %s3731_s18, 128  ;;  %p3174_p8 = scmp.lt.u32.totalorder %s3731_s18, %s4347_s0 }
  0x84   : > { %p3169_p10 = scmp.ne.s32.totalorder %s3731_s18, %s3168_s8  ;;  %p3175_p11 = scmp.lt.u32.totalorder %s3173_s23, %s3168_s8 }
  0x85   : > { %p3177_p9 = scmp.lt.u32.totalorder %s3168_s8, %s3731_s18 }
  0x86   : > { %p3171_p3 = pnand %p3170_p12, %p3169_p10  ;;  %p3176_p0 = por %p3175_p11, %p3174_p8 }
  0x88   : > { %p3172_p2 = pneg %p3171_p3  ;;  %p3178_p6 = por %p3177_p9, %p3176_p0 }
  0x8a   : > { %p3179_p1 = pnand %p3178_p6, %p3172_p2 }
  0x8c   : > { %3182 = shalt.err (!%p3179_p1)
}
  0x8d   : > { %s3183_s12 = scalar_lea.vmem %s3742_s27, 128  ;;  %s3396_s6 = smov [#allocation3]  }
  0x8e   : > { %p3184_p10 = scmp.ne.s32.totalorder %s3742_s27, %s3183_s12  ;;  %s3188_s14 = sshll.u32 %s3396_s6, 4  ;;  %s3189_s14 = int_to_ptr.vmem [resolvable:$false] %s3188_s14 }
  0x8f   : > { %s3190_s20 = scalar_lea.vmem %s3189_s14, 256  ;;  %p3191_p4 = scmp.lt.s32.totalorder %s3742_s27, %s3189_s14 }
  0x90   : > { %p3186_p3 = pnand %p3184_p10, %p3170_p12  ;;  %p3192_p8 = scmp.lt.s32.totalorder %s3190_s20, %s3183_s12 }
  0x92   : > { %p3187_p5 = pneg %p3186_p3  ;;  %p3193_p11 = por %p3192_p8, %p3191_p4 }
  0x94   : > { %p3194_p9 = pnand %p3193_p11, %p3187_p5 }
  0x96   : > { %3197 = shalt.err (!%p3194_p9)
}
  0x97   : > { %2963 = dma.hbm_to_vmem [thread:$0]  (!%p3737_p13), %s3731_s18, 128, %s3742_s27, %s480_s5  }
  0x98   : > { %s2597_s23 = sshll.u32 %s3380_s26, 9  ;;  %s4350_s3 = sld [smem:[#allocation38_spill]] }
  0x99   : > { %s529_s11 = scalar_lea.vmem [#allocation8], %s2546_s24 }
  0x9a   : > { %s536_s12 = sshll.u32 %s529_s11, 4  ;;  %s3777_s12 = int_to_ptr.vmem [resolvable:$true] %s536_s12 }
  0x9e   : > { %s3773_s2 = scalar_lea.hbm %s4350_s3, %s2597_s23  ;;  %s3203_s5 = scalar_lea.hbm %s4350_s3, 1024 }
  0x9f   : > { %s3198_s1 = scalar_lea.hbm %s3773_s2, 512  ;;  %p3204_p6 = scmp.lt.u32.totalorder %s3773_s2, %s4350_s3 }
  0xa0   : > { %p3199_p4 = scmp.ne.s32.totalorder %s3773_s2, %s3198_s1  ;;  %p3205_p13 = scmp.lt.u32.totalorder %s3203_s5, %s3198_s1 }
  0xa1   : > { %p3207_p2 = scmp.lt.u32.totalorder %s3198_s1, %s3773_s2 }
  0xa2   : > { %p3201_p5 = pnand %p3199_p4, %p3576_p7  ;;  %p3206_p12 = por %p3205_p13, %p3204_p6 }
  0xa4   : > { %p3202_p1 = pneg %p3201_p5  ;;  %p3208_p0 = por %p3207_p2, %p3206_p12 }
  0xa6   : > { %p3209_p10 = pnand %p3208_p0, %p3202_p1 }
  0xa8   : > { %3212 = shalt.err (!%p3209_p10)
}
  0xa9   : > { %s3213_s24 = scalar_lea.vmem %s3777_s12, 512  ;;  %s3397_s16 = smov [#allocation8]  }
  0xaa   : > { %p3214_p3 = scmp.ne.s32.totalorder %s3777_s12, %s3213_s24  ;;  %s3218_s20 = sshll.u32 %s3397_s16, 4  ;;  %s3219_s20 = int_to_ptr.vmem [resolvable:$false] %s3218_s20 }
  0xab   : > { %s3220_s23 = scalar_lea.vmem %s3219_s20, 1024  ;;  %p3221_p9 = scmp.lt.s32.totalorder %s3777_s12, %s3219_s20 }
  0xac   : > { %p3216_p8 = pnand %p3214_p3, %p3576_p7  ;;  %p3222_p4 = scmp.lt.s32.totalorder %s3220_s23, %s3213_s24 }
  0xae   : > { %p3217_p11 = pneg %p3216_p8  ;;  %p3223_p5 = por %p3222_p4, %p3221_p9 }
  0xb0   : > { %p3224_p6 = pnand %p3223_p5, %p3217_p11 }
  0xb2   : > { %3227 = shalt.err (!%p3224_p6)
}
  0xb3   : > { %p4351_p1 = scmp.ne.s32.totalorder %s4322_s25, 0  ;;  %s4352_s29 = smov 8  }
  0xb4   : > { %s4353_s8 = smov 128   ;;  %s3228_s11 = scalar_lea.hbm %s3654_s9, 2048 }
  0xb5   : > { %2969 = dma.hbm_to_vmem [thread:$0]  (!%p4351_p1), %s3773_s2, 512, %s3777_s12, %s3570_s10, %s4353_s8, %s4353_s8, %s4352_s29  }
  0xb6   : > { %p3229_p13 = scmp.ne.s32.totalorder %s3654_s9, %s3228_s11  ;;  %s3233_s18 = scalar_lea.hbm %s4331_s7, 4096 }
  0xb7   : > { %p3234_p0 = scmp.lt.u32.totalorder %s3654_s9, %s4331_s7  ;;  %p3235_p10 = scmp.lt.u32.totalorder %s3233_s18, %s3228_s11 }
  0xb8   : > { %p3231_p12 = pnand %p3229_p13, %p3576_p7  ;;  %p3237_p8 = scmp.lt.u32.totalorder %s3228_s11, %s3654_s9 }
  0xb9   : > { %p3236_p3 = por %p3235_p10, %p3234_p0 }
  0xba   : > { %p3232_p2 = pneg %p3231_p12 }
  0xbb   : > { %p3238_p11 = por %p3237_p8, %p3236_p3 }
  0xbd   : > { %p3239_p9 = pnand %p3238_p11, %p3232_p2 }
  0xbf   : > { %3242 = shalt.err (!%p3239_p9)
}
  0xc0   : > { %s3243_s10 = scalar_lea.vmem %s3658_s4, 2048  ;;  %s3398_s2 = smov [#allocation11]  }
  0xc1   : > { %p3244_p4 = scmp.ne.s32.totalorder %s3658_s4, %s3243_s10  ;;  %s3248_s12 = sshll.u32 %s3398_s2, 4  ;;  %s3249_s12 = int_to_ptr.vmem [resolvable:$false] %s3248_s12 }
  0xc2   : > { %s3250_s14 = scalar_lea.vmem %s3249_s12, 4096  ;;  %p3251_p13 = scmp.lt.s32.totalorder %s3658_s4, %s3249_s12 }
  0xc3   : > { %p3246_p5 = pnand %p3244_p4, %p3576_p7  ;;  %p3252_p12 = scmp.lt.s32.totalorder %s3250_s14, %s3243_s10 }
  0xc5   : > { %p3247_p6 = pneg %p3246_p5  ;;  %p3253_p0 = por %p3252_p12, %p3251_p13 }
  0xc7   : > { %p3254_p10 = pnand %p3253_p0, %p3247_p6 }
  0xc9   : > { %3257 = shalt.err (!%p3254_p10)
}
  0xca   : > { %2975 = dma.hbm_to_vmem [thread:$0]  (!%p4351_p1), %s3654_s9, 2048, %s3658_s4, %s3622_s30, %s4353_s8, %s4353_s8, %s4352_s29  }
  0xcb   : > { %p4354_p7 = scmp.ne.s32.totalorder %s4327_s17, 0 }
  0xcc   : > { %s4355_s13 = sld [smem:[#allocation30_spill]] (!%p4354_p7)  ;;  %s3832_s24 = sand.u32 (!%p4354_p7), 1, %s3364_s22  }
  0xcd   : > { %632 = sbr.rel (%p4354_p7) target bundleno = 4265 (0x10a9), region = 80  ;;  %s4289_s16 = sshll.u32 (!%p4354_p7), %s3832_s24, 3 }
  0xce   : > { %s635_s20 = scalar_lea.sflag (!%p4354_p7), [#allocation4], %s3832_s24  ;;  %s3838_s25 = scalar_lea.vmem (!%p4354_p7), [#allocation3], %s4289_s16 }
  0xd2   : > { %p4356_p2 = scmp.ne.s32.totalorder (!%p4354_p7), %s4355_s13, 0 }
  0xd4   : > { %3331 = dma.done.wait (%p4356_p2), %s635_s20, 128  }
  0xd5   : > { %3333 = vsyncadd (%p4356_p2), %s635_s20, 4294967168  ;;  %s4357_s30 = sld [smem:[#allocation27_spill]]  ;;  %s4358_s17 = sld [smem:[#allocation17_spill]] }
  0xd6   : > { %s4359_s9 = sld [smem:[#allocation31_spill]] }
  0xdb   : > { %s643_s4 = sand.u32 1, %s4357_s30   ;;  %s3846_s23 = sand.u32 1, %s4358_s17  }
  0xdc   : > { %s2946_s29 = smul.u32 384, %s3846_s23  ;;  %s644_s8 = scalar_lea.sflag [#allocation7], %s643_s4 }
  0xdd   : > { %p4360_p1 = scmp.ne.s32.totalorder %s4359_s9, 0 }
  0xde   : > { %s3849_s11 = scalar_lea.vmem [#allocation6], %s2946_s29 }
  0xdf   : > { %3335 = dma.done.wait (%p4360_p1), %s644_s8, 6656  }
  0xe0   : > { %3337 = vsyncadd (%p4360_p1), %s644_s8, 4294960640  ;;  %s2557_s1 = sshll.u32 %s3846_s23, 5  ;;  %s2558_s27 = sshll.u32 %s3846_s23, 7 }
  0xe1   : > { %s3857_s18 = scalar_lea.vmem [#allocation8], %s2557_s1  ;;  %s662_s5 = scalar_lea.sflag [#allocation10], %s643_s4 }
  0xe2   : > { %s3859_s6 = scalar_lea.vmem [#allocation9], %s2558_s27 }
  0xe3   : > { %3339 = dma.done.wait (%p4360_p1), %s662_s5, 4096  }
  0xe4   : > { %3341 = vsyncadd (%p4360_p1), %s662_s5, 4294963200  ;;  %s4361_s10 = sld [smem:[#allocation22_spill]]  ;;  %v791_v0 = vlaneseq  ;;  %v3399_v2 = vmov 0.0   ;;  %s4365_s3 = sld [smem:[#allocation37_spill]] }
  0xe5   : > { %s4366_s13 = sld [smem:[#allocation44_spill]]  ;;  %s4367_s15 = sld [smem:[#allocation45_spill]] }
  0xe6   : > { %v792_v1 = vand.u32 127, %v791_v0  ;;  %s4368_s9 = sld [smem:[#allocation46_spill]]  ;;  %s4369_s8 = sld [smem:[#allocation47_spill]] }
  0xe7   : > { %s3907_s5 = scalar_lea.vmem [#allocation11], %s2558_s27  ;;  %s4370_s0 = sshll.u32 %s3832_s24, 3 }
  0xe8   : > { %vm793_vm0 = vcmp.lt.s32.totalorder %v792_v1, 32 }
  0xe9   : > { %v3876_v3 = vsel %vm793_vm0, 1.0, %v3399_v2 }
  0xea   : > { %p766_p3 = scmp.lt.s32.totalorder %s4361_s10, 1  ;;  %p2562_p8 = scmp.ne.s32.totalorder %s4361_s10, 0 }
  0xeb   : > { %v800_v4 = vld [vmem:[%s3838_s25] sm:$0xff] (!%p2562_p8) }
  0xec   : > { %s3868_s2 = scalar_select %p766_p3, %s4361_s10, 1 }
  0xed   : > { %799 = sbr.rel (%p2562_p8) target bundleno = 244 (0xf4), region = 104  ;;  %801 = vst [vmem:[#allocation2] sm:$0xff] (!%p2562_p8), %v800_v4 }
  0xee   : > { %s2947_s12 = smul.u32 3, %s3868_s2  ;;  %s781_s20 = scalar_lea.vmem %s4366_s13, %s3868_s2 }
  0xef   : > { %s784_s21 = scalar_lea.vmem %s4367_s15, %s3868_s2  ;;  %s787_s4 = scalar_lea.vmem %s4368_s9, %s3868_s2 }
  0xf0   : > { %s3889_s7 = scalar_lea.vmem %s4365_s3, %s2947_s12  ;;  %s790_s1 = scalar_lea.vmem %s4369_s8, %s3868_s2 }
  0xf1   : > { %s3911_s3 = scalar_lea.vmem [#allocation12], %s4370_s0 }
  0xf4 PF: > { %v3915_v5 = vld [vmem:[#allocation2] sm:$0xff]  ;;  %967 = vmatprep.mubr.f32.mxu0 %v3399_v2  ;;  %v842_v12 = vld [vmem:[%s3849_s11 + $0x20] sm:$0xff]  ;;  %v841_v15 = vld [vmem:[%s3849_s11 + $0x18] sm:$0xff]  ;;  %v3400_v19 = vmov 0.0|0.0   ;;  %vm3401_vm1 = vmmov 0   ;;  %vm1044_vm4 = vcmask 64512  }
  0xf5   : > { %805 = vadd.xlane.f32.xlu0 %v3915_v5  ;;  %v839_v11 = vld [vmem:[%s3849_s11 + $0x8] sm:$0xff]  ;;  %v838_v14 = vld [vmem:[%s3849_s11] sm:$0xff]  ;;  %v840_v16 = vld [vmem:[%s3849_s11 + $0x10] sm:$0xff]  ;;  %2872 = vmatprep.subr.bf16.mxu1 %v3400_v19  ;;  %s4373_s10 = sld [smem:[#allocation39_spill]]  ;;  %s4377_s29 = sld [smem:[#allocation41_spill]] }
  0xf6   : > { %v2840_v13 = vpack.c.bf16 %v842_v12, %v839_v11  ;;  %v2842_v17 = vpack.c.bf16 %v841_v15, %v838_v14  ;;  %v843_v18 = vld [vmem:[%s3849_s11 + $0x28] sm:$0xff]  ;;  %v845_v21 = vld [vmem:[%s3849_s11 + $0x38] sm:$0xff]  ;;  %v848_v22 = vld [vmem:[%s3849_s11 + $0x50] sm:$0xff]  ;;  %2707 = vmatprep.mubr.msk.f32.mxu1 %vm3401_vm1, %v3399_v2 }
  0xf7   : > { %v2873_v20 = vpack.c.bf16 %v843_v18, %v840_v16  ;;  %v2844_v23 = vpack.c.bf16 %v848_v22, %v845_v21  ;;  %v844_v24 = vld [vmem:[%s3849_s11 + $0x30] sm:$0xff]  ;;  %v847_v25 = vld [vmem:[%s3849_s11 + $0x48] sm:$0xff]  ;;  %v846_v26 = vld [vmem:[%s3849_s11 + $0x40] sm:$0xff] }
  0xf8   : > { %2841 = vmatprep.subr.bf16.mxu0 %v2840_v13  ;;  %v2846_v27 = vpack.c.bf16 %v847_v25, %v844_v24  ;;  %v849_v28 = vld [vmem:[%s3849_s11 + $0x58] sm:$0xff]  ;;  %v851_v30 = vld [vmem:[%s3849_s11 + $0x68] sm:$0xff]  ;;  %v854_v31 = vld [vmem:[%s3849_s11 + $0x80] sm:$0xff] }
  0xf9   : > { %2843 = vmatpush1.bf16.msra.mxu0 %v2842_v17  ;;  %2874 = vmatpush3.bf16.msra.mxu1 %v2873_v20  ;;  %v2876_v29 = vpack.c.bf16 %v849_v28, %v846_v26  ;;  %v2848_v32 = vpack.c.bf16 %v854_v31, %v851_v30  ;;  %v850_v33 = vld [vmem:[%s3849_s11 + $0x60] sm:$0xff]  ;;  %v853_v34 = vld [vmem:[%s3849_s11 + $0x78] sm:$0xff]  ;;  %v852_v35 = vld [vmem:[%s3849_s11 + $0x70] sm:$0xff] }
  0xfa   : > { %2875 = vmatprep.subr.bf16.mxu1 %v3400_v19  ;;  %2845 = vmatprep.subr.bf16.mxu0 %v2844_v23  ;;  %v2850_v36 = vpack.c.bf16 %v853_v34, %v850_v33  ;;  %v855_v37 = vld [vmem:[%s3849_s11 + $0x88] sm:$0xff]  ;;  %v857_v39 = vld [vmem:[%s3849_s11 + $0x98] sm:$0xff]  ;;  %v860_v40 = vld [vmem:[%s3849_s11 + $0xb0] sm:$0xff] }
  0xfb   : > { %v2879_v38 = vpack.c.bf16 %v855_v37, %v852_v35  ;;  %v2852_v41 = vpack.c.bf16 %v860_v40, %v857_v39  ;;  %v856_v42 = vld [vmem:[%s3849_s11 + $0x90] sm:$0xff]  ;;  %v859_v43 = vld [vmem:[%s3849_s11 + $0xa8] sm:$0xff]  ;;  %v858_v44 = vld [vmem:[%s3849_s11 + $0xa0] sm:$0xff]  ;;  %v889_v40 = vshrl.u32 %v791_v0, 7  ;;  %s4374_s12 = scalar_lea.vmem %s4373_s10, %s3868_s2  ;;  %s4378_s8 = scalar_lea.vmem %s4377_s29, %s3868_s2 }
  0xfc   : > { %v2854_v45 = vpack.c.bf16 %v859_v43, %v856_v42  ;;  %v861_v46 = vld [vmem:[%s3849_s11 + $0xb8] sm:$0xff]  ;;  %v863_v47 = vld [vmem:[%s3849_s11 + $0xc8] sm:$0xff]  ;;  %v866_v48 = vld [vmem:[%s3849_s11 + $0xe0] sm:$0xff] }
  0xfd   : > { %2847 = vmatpush1.bf16.msra.mxu0 %v2846_v27  ;;  %2877 = vmatpush3.bf16.msra.mxu1 %v2876_v29  ;;  %v2882_v49 = vpack.c.bf16 %v861_v46, %v858_v44  ;;  %v2856_v50 = vpack.c.bf16 %v866_v48, %v863_v47  ;;  %v862_v51 = vld [vmem:[%s3849_s11 + $0xc0] sm:$0xff]  ;;  %v865_v52 = vld [vmem:[%s3849_s11 + $0xd8] sm:$0xff]  ;;  %v864_v53 = vld [vmem:[%s3849_s11 + $0xd0] sm:$0xff]  ;;  %v890_v43 = vsub.s32 0, %v889_v40 }
  0xfe   : > { %2878 = vmatprep.subr.bf16.mxu1 %v3400_v19  ;;  %2849 = vmatprep.subr.bf16.mxu0 %v2848_v32  ;;  %v2858_v54 = vpack.c.bf16 %v865_v52, %v862_v51  ;;  %v867_v55 = vld [vmem:[%s3849_s11 + $0xe8] sm:$0xff]  ;;  %v869_v56 = vld [vmem:[%s3849_s11 + $0xf8] sm:$0xff]  ;;  %v872_v57 = vld [vmem:[%s3849_s11 + $0x110] sm:$0xff] }
  0xff   : > { %v2885_v58 = vpack.c.bf16 %v867_v55, %v864_v53  ;;  %v2860_v59 = vpack.c.bf16 %v872_v57, %v869_v56  ;;  %v868_v60 = vld [vmem:[%s3849_s11 + $0xf0] sm:$0xff]  ;;  %v871_v61 = vld [vmem:[%s3849_s11 + $0x108] sm:$0xff]  ;;  %v870_v62 = vld [vmem:[%s3849_s11 + $0x100] sm:$0xff] }
 0x100   : > { %v873_v63 = vld [vmem:[%s3849_s11 + $0x118] sm:$0xff]  ;;  %v875_v1 = vld [vmem:[%s3849_s11 + $0x128] sm:$0xff]  ;;  %v878_v4 = vld [vmem:[%s3849_s11 + $0x140] sm:$0xff] }
 0x101   : > { %2851 = vmatpush1.bf16.msra.mxu0 %v2850_v36  ;;  %2880 = vmatpush3.bf16.msra.mxu1 %v2879_v38  ;;  %v877_v11 = vld [vmem:[%s3849_s11 + $0x138] sm:$0xff]  ;;  %v876_v12 = vld [vmem:[%s3849_s11 + $0x130] sm:$0xff]  ;;  %v879_v13 = vld [vmem:[%s3849_s11 + $0x148] sm:$0xff] }
 0x102   : > { %2881 = vmatprep.subr.bf16.mxu1 %v3400_v19  ;;  %2853 = vmatprep.subr.bf16.mxu0 %v2852_v41  ;;  %v881_v14 = vld [vmem:[%s3849_s11 + $0x158] sm:$0xff]  ;;  %v884_v15 = vld [vmem:[%s3849_s11 + $0x170] sm:$0xff]  ;;  %v2891_v17 = vpack.c.bf16 %v879_v13, %v876_v12  ;;  %v883_v21 = vld [vmem:[%s3849_s11 + $0x168] sm:$0xff]  ;;  %v898_v41 = vsub.s32 2, %v889_v40 }
 0x103   : > { %v2868_v18 = vpack.c.bf16 %v884_v15, %v881_v14  ;;  %v880_v20 = vld [vmem:[%s3849_s11 + $0x150] sm:$0xff]  ;;  %v882_v22 = vld [vmem:[%s3849_s11 + $0x160] sm:$0xff]  ;;  %v885_v23 = vld [vmem:[%s3849_s11 + $0x178] sm:$0xff] }
 0x104   : > { %v2870_v24 = vpack.c.bf16 %v883_v21, %v880_v20  ;;  %v2894_v25 = vpack.c.bf16 %v885_v23, %v882_v22  ;;  %v2563_v35 = vld [vmem:[%s781_s20] ss:$0 sm:$0xff]  ;;  %v1206_v23 = vld [vmem:[%s3857_s18] sm:$0xff] }
 0x105   : > { %2855 = vmatpush1.bf16.msra.mxu0 %v2854_v45  ;;  %2883 = vmatpush3.bf16.msra.mxu1 %v2882_v49  ;;  %v2564_v37 = vld [vmem:[%s784_s21] ss:$0 sm:$0xff]  ;;  %s3402_s21 = smov 120  }
 0x106   : > { %2857 = vmatprep.subr.bf16.mxu0 %v2856_v50  ;;  %2884 = vmatprep.subr.bf16.mxu1 %v3400_v19  ;;  %v886_v42 = vld [vmem:[%s3889_s7] sm:$0x7]  ;;  %s3403_s7 = smov 112  }
 0x107   : > { %v899_v44 = vrot.slane %v886_v42, %v898_v41  ;;  %v891_v48 = vrot.slane %v886_v42, %v890_v43 }
 0x109   : > { %2859 = vmatpush1.bf16.msra.mxu0 %v2858_v54  ;;  %2886 = vmatpush3.bf16.msra.mxu1 %v2885_v58 }
 0x10a   : > { %2861 = vmatprep.subr.bf16.mxu0 %v2860_v59  ;;  %2887 = vmatprep.subr.bf16.mxu1 %v3400_v19 }
 0x182   : > { %v806_v6 = vpop.xlane.xlu0 %805 }
 0x183   : > { %v807_v7 = vmul.f32 0.03125, %v806_v6  ;;  %v2862_v6 = vpack.c.bf16 %v871_v61, %v868_v60 }
 0x185   : > { %v808_v8 = vsub.f32 %v3915_v5, %v807_v7  ;;  %v2888_v7 = vpack.c.bf16 %v873_v63, %v870_v62  ;;  %2863 = vmatpush1.bf16.msra.mxu0 %v2862_v6 }
 0x187   : > { %v3921_v9 = vmul.f32 %v3876_v3, %v808_v8  ;;  %v2864_v8 = vpack.c.bf16 %v878_v4, %v875_v1  ;;  %2889 = vmatpush3.bf16.msra.mxu1 %v2888_v7 }
 0x188   : > { %2890 = vmatprep.subr.bf16.mxu1 %v3400_v19 }
 0x189   : > { %v810_v10 = vmul.f32 %v3921_v9, %v3921_v9  ;;  %2865 = vmatprep.subr.bf16.mxu0 %v2864_v8 }
 0x18b   : > { %811 = vadd.xlane.f32.xlu0 %v810_v10  ;;  %v874_v10 = vld [vmem:[%s3849_s11 + $0x120] sm:$0xff]  ;;  %2892 = vmatpush3.bf16.msra.mxu1 %v2891_v17  ;;  %v2571_v17 = vld [vmem:[%s3857_s18 + $0x8] sm:$0xff]  ;;  %s3404_s11 = smov 104  }
 0x18c   : > { %v2866_v16 = vpack.c.bf16 %v877_v11, %v874_v10  ;;  %2893 = vmatprep.subr.bf16.mxu1 %v3400_v19 }
 0x18e   : > { %2867 = vmatpush1.bf16.msra.mxu0 %v2866_v16 }
 0x18f   : > { %2869 = vmatprep.subr.bf16.mxu0 %v2868_v18  ;;  %2895 = vmatpush3.bf16.msra.mxu1 %v2894_v25 }
 0x190   : > { %2715 = vmatprep.subr.mxu1 %v3399_v2 }
 0x192   : > { %2871 = vmatpush1.bf16.msra.mxu0 %v2870_v24 }
 0x193   : > { %2710 = vmatprep.subr.mxu0 %v3399_v2 }
 0x218   : > { %v812_v26 = vpop.xlane.xlu0 %811 }
 0x219   : > { %v813_v27 = vmul.f32 0.032258064, %v812_v26 }
 0x21b   : > { %3080 = vrsqrt.f32 %v813_v27  ;;  %vm816_vm2 = vcmp.eq.f32.partialorder %v813_v27, inf  ;;  %v819_v30 = vand.u32 2147483648, %v813_v27  ;;  %vm818_vm3 = vcmp.eq.f32.partialorder %v813_v27, 0.0 }
 0x225   : > { %v3081_v28 = vpop.eup %3080 }
 0x226   : > { %v815_v29 = vmul.f32 %v3081_v28, %v813_v27 }
 0x228   : > { %v817_v31 = vsel %vm816_vm2, %v813_v27, %v815_v29 }
 0x229   : > { %v820_v32 = vsel %vm818_vm3, %v819_v30, %v817_v31 }
 0x22a   : > { %v821_v33 = vadd.f32 1e-06, %v820_v32 }
 0x22c   : > { %3082 = vrcp.f32 %v821_v33 }
 0x236   : > { %v3083_v34 = vpop.eup %3082 }
 0x237   : > { %v823_v36 = vmul.f32 %v3083_v34, %v3921_v9  ;;  %v894_v9 = vsub.s32 1, %v889_v40 }
 0x239   : > { %v830_v38 = vmul.f32 %v2563_v35, %v823_v36  ;;  %v895_v45 = vrot.slane %v886_v42, %v894_v9 }
 0x23b   : > { %v837_v39 = vadd.f32 %v2564_v37, %v830_v38 }
 0x23d   : > { %968 = vmatmul.mubr.f32.vlgmr.msra.gmra.mrb[0].mxu0 %v837_v39  ;;  %2708 = vmatmul.mubr.f32.vlgmr.msra.gmra.mrb[0].mxu1 %v837_v39 }
 0x23e   : > { %2712 = vmatprep.mubr.msk.f32.mxu0 %vm3401_vm1, %v3399_v2  ;;  %2717 = vmatprep.mubr.msk.f32.mxu1 %vm3401_vm1, %v3399_v2 }
 0x310   : > { %v969_v46 = vpop.f32.mrb[0].mxu0  ;;  %v1040_v47 = vpop.f32.mrb[0].mxu1 }
 0x311   : > { %v4002_v49 = vadd.f32 %v1040_v47, %v899_v44  ;;  %v971_v50 = vpop.f32.mrb[1].mxu0  ;;  %v2709_v51 = vpop.f32.mrb[1].mxu1  ;;  %v4011_v0 = vadd.f32 %v969_v46, %v891_v48 }
 0x312   : > { %v4004_v52 = vadd.f32 %v971_v50, %v895_v45  ;;  %v2577_v50 = vld [vmem:[%s3857_s18 + $0x10] sm:$0xff] }
 0x313   : > { %2716 = vmatpush3.msra.mxu1 %v4002_v49 }
 0x314   : > { %1209 = vrot.lane.b32.xlu1 %v4004_v52, %s3402_s21  ;;  %2711 = vmatpush3.xpose.msk.msra.mxu0 %vm1044_vm4, %v4004_v52 }
 0x315   : > { %2720 = vmatprep.subr.mxu0 %v3399_v2  ;;  %2725 = vmatprep.subr.mxu1 %v3399_v2 }
 0x317   : > { %2713 = vmatmul.mubr.msk.f32.vlgmr.msra.gmra.mrb[2].mxu0 %vm1044_vm4, %v4011_v0 }
 0x318   : > { %1207 = vrot.lane.b32.xlu1 %v4011_v0, %s3402_s21  ;;  %2722 = vmatprep.mubr.msk.f32.mxu0 %vm3401_vm1, %v3399_v2 }
 0x386   : > { %v1210_v53 = vpop.permute.xlu1 %1209 }
 0x387   : > { %2721 = vmatpush3.xpose.msk.msra.mxu0 %vm1044_vm4, %v1210_v53 }
 0x388   : > { %2730 = vmatprep.subr.mxu0 %v3399_v2 }
 0x38a   : > { %v1208_v54 = vpop.permute.xlu1 %1207 }
 0x38b   : > { %2723 = vmatmul.mubr.msk.f32.vlgmr.msra.gmra.mrb[4].mxu0 %vm1044_vm4, %v1208_v54 }
 0x38c   : > { %2732 = vmatprep.mubr.msk.f32.mxu0 %vm3401_vm1, %v3399_v2  ;;  %2731 = vmatpush3.msra.mxu0 %v2571_v17 }
 0x38d   : > { %2740 = vmatprep.subr.mxu0 %v3399_v2 }
 0x3ea   : > { %v1117_v55 = vpop.f32.mrb[2].mxu0 }
 0x3eb   : > { %v1121_v56 = vmul.f32 0.35355338, %v1117_v55  ;;  %v2714_v57 = vpop.f32.mrb[3].mxu0 }
 0x3ed   : > { %v1122_v58 = vsel %vm1044_vm4, %v1121_v56, -inf }
 0x3ee   : > { %1123 = vmax.xlane.f32.xlu0 %v1122_v58 }
 0x45e   : > { %v1281_v59 = vpop.f32.mrb[4].mxu0 }
 0x45f   : > { %v1285_v60 = vmul.f32 0.35355338, %v1281_v59  ;;  %v2724_v61 = vpop.f32.mrb[5].mxu0 }
 0x461   : > { %v1286_v62 = vsel %vm1044_vm4, %v1285_v60, -inf }
 0x462   : > { %1287 = vmax.xlane.f32.xlu1 %v1286_v62  ;;  %v2582_v62 = vld [vmem:[%s3857_s18 + $0x18] sm:$0xff] }
 0x473   : > { %1522 = vrot.lane.b32.xlu1 %v4011_v0, %s3403_s7 }
 0x47b   : > { %v1124_v63 = vpop.xlane.xlu0 %1123 }
 0x47c   : > { %v1125_v1 = vsub.f32 %v1121_v56, %v1124_v63 }
 0x47e   : > { %v1126_v4 = vmul.f32 1.442695, %v1125_v1 }
 0x480   : > { %3084 = vpow2.f32 %v1126_v4 }
 0x48a   : > { %v3085_v6 = vpop.eup %3084 }
 0x48b   : > { %v1128_v7 = vsel %vm1044_vm4, %v3085_v6, 0.0 }
 0x48c   : > { %1129 = vadd.xlane.f32.xlu0 %v1128_v7 }
 0x4ef   : > { %v1288_v8 = vpop.xlane.xlu1 %1287 }
 0x4f0   : > { %v1289_v10 = vsub.f32 %v1285_v60, %v1288_v8 }
 0x4f2   : > { %v1290_v11 = vmul.f32 1.442695, %v1289_v10 }
 0x4f3   : > { %v1523_v29 = vpop.permute.xlu1 %1522 }
 0x4f4   : > { %3086 = vpow2.f32 %v1290_v11 }
 0x4fe   : > { %v3087_v12 = vpop.eup %3086 }
 0x4ff   : > { %v1292_v13 = vsel %vm1044_vm4, %v3087_v12, 0.0 }
 0x500   : > { %1293 = vadd.xlane.f32.xlu0 %v1292_v13 }
 0x516   : > { %1298 = vrot.lane.b32.xlu0 %v4002_v49, %s3402_s21 }
 0x519   : > { %v1130_v14 = vpop.xlane.xlu0 %1129 }
 0x51a   : > { %3088 = vrcp.f32 %v1130_v14  ;;  %1524 = vrot.lane.b32.xlu0 %v4004_v52, %s3403_s7  ;;  %v2584_v14 = vld [vmem:[%s4374_s12] ss:$0 sm:$0xff] }
 0x524   : > { %v3089_v15 = vpop.eup %3088 }
 0x525   : > { %v1132_v16 = vmul.f32 %v3089_v15, %v3085_v6 }
 0x527   : > { %2718 = vmatmul.mubr.msk.f32.vlgmr.msra.gmra.mrb[2].mxu1 %vm1044_vm4, %v1132_v16 }
 0x528   : > { %2727 = vmatprep.mubr.msk.f32.mxu1 %vm3401_vm1, %v3399_v2 }
 0x58d   : > { %v1294_v18 = vpop.xlane.xlu0 %1293 }
 0x58e   : > { %3090 = vrcp.f32 %v1294_v18 }
 0x591   : > { %v1299_v20 = vpop.permute.xlu0 %1298 }
 0x592   : > { %2726 = vmatpush3.msra.mxu1 %v1299_v20 }
 0x593   : > { %2735 = vmatprep.subr.mxu1 %v3399_v2 }
 0x595   : > { %v1525_v27 = vpop.permute.xlu0 %1524 }
 0x598   : > { %v3091_v21 = vpop.eup %3090 }
 0x599   : > { %v1296_v22 = vmul.f32 %v3091_v21, %v3087_v12 }
 0x59b   : > { %2728 = vmatmul.mubr.msk.f32.vlgmr.msra.gmra.mrb[4].mxu1 %vm1044_vm4, %v1296_v22  ;;  %v2050_v22 = vld [vmem:[%s3859_s6] sm:$0xff] }
 0x59c   : > { %2736 = vmatpush3.msra.mxu1 %v1206_v23  ;;  %2737 = vmatprep.mubr.msk.f32.mxu1 %vm3401_vm1, %v3399_v2 }
 0x59d   : > { %2745 = vmatprep.subr.mxu1 %v3399_v2 }
 0x5fa   : > { %v1202_v24 = vpop.f32.mrb[2].mxu1 }
 0x5fb   : > { %v2719_v25 = vpop.f32.mrb[3].mxu1  ;;  %2738 = vmatmul.mubr.msk.f32.vlgmr.msra.gmra.mrb[6].mxu1 %vm1044_vm4, %v1202_v24  ;;  %v2052_v24 = vld [vmem:[%s3859_s6 + $0x10] sm:$0xff] }
 0x5fc   : > { %2747 = vmatprep.mubr.msk.f32.mxu1 %vm3401_vm1, %v3399_v2  ;;  %v2053_v25 = vld [vmem:[%s3859_s6 + $0x18] sm:$0xff] }
 0x66e   : > { %v1370_v26 = vpop.f32.mrb[4].mxu1 }
 0x66f   : > { %v2729_v28 = vpop.f32.mrb[5].mxu1  ;;  %2733 = vmatmul.mubr.msk.f32.vlgmr.msra.gmra.mrb[6].mxu0 %vm1044_vm4, %v1370_v26  ;;  %v2900_v26 = vpack.c.bf16 %v2053_v25, %v2052_v24 }
 0x670   : > { %2741 = vmatpush3.xpose.msk.msra.mxu0 %vm1044_vm4, %v1525_v27  ;;  %2742 = vmatprep.mubr.msk.f32.mxu0 %vm3401_vm1, %v3399_v2  ;;  %v2054_v27 = vld [vmem:[%s3859_s6 + $0x20] sm:$0xff]  ;;  %v2055_v28 = vld [vmem:[%s3859_s6 + $0x28] sm:$0xff] }
 0x671   : > { %2750 = vmatprep.subr.mxu0 %v3399_v2 }
 0x673   : > { %2743 = vmatmul.mubr.msk.f32.vlgmr.msra.gmra.mrb[8].mxu0 %vm1044_vm4, %v1523_v29  ;;  %v2903_v29 = vpack.c.bf16 %v2055_v28, %v2054_v27 }
 0x674   : > { %2752 = vmatprep.mubr.msk.f32.mxu0 %vm3401_vm1, %v3399_v2  ;;  %2751 = vmatpush3.msra.mxu0 %v2577_v50 }
 0x675   : > { %2760 = vmatprep.subr.mxu0 %v3399_v2 }
 0x6ce   : > { %v1518_v30 = vpop.f32.mrb[6].mxu1 }
 0x6cf   : > { %v2739_v31 = vpop.f32.mrb[7].mxu1 }
 0x6d0   : > { %v2057_v31 = vld [vmem:[%s3859_s6 + $0x38] sm:$0xff] }
 0x742   : > { %v1445_v32 = vpop.f32.mrb[6].mxu0 }
 0x743   : > { %v1519_v33 = vadd.f32 %v1518_v30, %v1445_v32  ;;  %v2734_v34 = vpop.f32.mrb[7].mxu0  ;;  %v2056_v30 = vld [vmem:[%s3859_s6 + $0x30] sm:$0xff] }
 0x744   : > { %v2906_v32 = vpack.c.bf16 %v2057_v31, %v2056_v30  ;;  %v2059_v34 = vld [vmem:[%s3859_s6 + $0x48] sm:$0xff] }
 0x746   : > { %v1596_v35 = vpop.f32.mrb[8].mxu0 }
 0x747   : > { %v1600_v36 = vmul.f32 0.35355338, %v1596_v35  ;;  %v2744_v37 = vpop.f32.mrb[9].mxu0  ;;  %v2060_v35 = vld [vmem:[%s3859_s6 + $0x50] sm:$0xff] }
 0x748   : > { %v2061_v37 = vld [vmem:[%s3859_s6 + $0x58] sm:$0xff] }
 0x749   : > { %v1601_v38 = vsel %vm1044_vm4, %v1600_v36, -inf }
 0x74a   : > { %1602 = vmax.xlane.f32.xlu0 %v1601_v38  ;;  %v2912_v38 = vpack.c.bf16 %v2061_v37, %v2060_v35 }
 0x760   : > { %1612 = vrot.lane.b32.xlu0 %v4002_v49, %s3403_s7 }
 0x764   : > { %1764 = vrot.lane.b32.xlu0 %v4011_v0, %s3404_s11 }
 0x7d7   : > { %v1603_v39 = vpop.xlane.xlu0 %1602 }
 0x7d8   : > { %v1604_v40 = vsub.f32 %v1600_v36, %v1603_v39  ;;  %v2062_v39 = vld [vmem:[%s3859_s6 + $0x60] sm:$0xff] }
 0x7da   : > { %v1605_v41 = vmul.f32 1.442695, %v1604_v40  ;;  %v2063_v40 = vld [vmem:[%s3859_s6 + $0x68] sm:$0xff] }
 0x7db   : > { %v1613_v42 = vpop.permute.xlu0 %1612 }
 0x7dc   : > { %3092 = vpow2.f32 %v1605_v41  ;;  %2746 = vmatpush3.msra.mxu1 %v1613_v42  ;;  %v2915_v41 = vpack.c.bf16 %v2063_v40, %v2062_v39  ;;  %v2064_v42 = vld [vmem:[%s3859_s6 + $0x70] sm:$0xff] }
 0x7dd   : > { %2755 = vmatprep.subr.mxu1 %v3399_v2 }
 0x7df   : > { %v1765_v48 = vpop.permute.xlu0 %1764 }
 0x7e6   : > { %v3093_v9 = vpop.eup %3092 }
 0x7e7   : > { %v1607_v43 = vsel %vm1044_vm4, %v3093_v9, 0.0 }
 0x7e8   : > { %1608 = vadd.xlane.f32.xlu1 %v1607_v43 }
 0x7f9   : > { %1766 = vrot.lane.b32.xlu1 %v4004_v52, %s3404_s11 }
 0x875   : > { %v1609_v44 = vpop.xlane.xlu1 %1608 }
 0x876   : > { %3094 = vrcp.f32 %v1609_v44  ;;  %v2144_v44 = vld [vmem:[%s3907_s5] sm:$0xff] }
 0x879   : > { %v1767_v47 = vpop.permute.xlu1 %1766 }
 0x880   : > { %v3095_v45 = vpop.eup %3094 }
 0x881   : > { %v1611_v46 = vmul.f32 %v3095_v45, %v3093_v9  ;;  %v2065_v9 = vld [vmem:[%s3859_s6 + $0x78] sm:$0xff]  ;;  %v2145_v45 = vld [vmem:[%s3907_s5 + $0x8] sm:$0xff] }
 0x882   : > { %v2918_v43 = vpack.c.bf16 %v2065_v9, %v2064_v42 }
 0x883   : > { %2748 = vmatmul.mubr.msk.f32.vlgmr.msra.gmra.mrb[8].mxu1 %vm1044_vm4, %v1611_v46  ;;  %v2146_v46 = vld [vmem:[%s3907_s5 + $0x10] sm:$0xff] }
 0x884   : > { %2756 = vmatpush3.xpose.msk.msra.mxu1 %vm1044_vm4, %v1767_v47  ;;  %2757 = vmatprep.mubr.msk.f32.mxu1 %vm3401_vm1, %v3399_v2  ;;  %v2921_v47 = vpack.c.bf16 %v2145_v45, %v2144_v44 }
 0x885   : > { %2765 = vmatprep.subr.mxu1 %v3399_v2 }
 0x887   : > { %2758 = vmatmul.mubr.msk.f32.vlgmr.msra.gmra.mrb[10].mxu1 %vm1044_vm4, %v1765_v48  ;;  %v2147_v48 = vld [vmem:[%s3907_s5 + $0x18] sm:$0xff] }
 0x888   : > { %2767 = vmatprep.mubr.msk.f32.mxu1 %vm3401_vm1, %v3399_v2  ;;  %2766 = vmatpush3.msra.mxu1 %v2582_v62  ;;  %v2924_v50 = vpack.c.bf16 %v2147_v48, %v2146_v46  ;;  %v2156_v62 = vld [vmem:[%s3907_s5 + $0x60] sm:$0xff] }
 0x889   : > { %2920 = vmatprep.subr.bf16.mxu1 %v3400_v19 }
 0x956   : > { %v1684_v51 = vpop.f32.mrb[8].mxu1 }
 0x957   : > { %v2749_v52 = vpop.f32.mrb[9].mxu1  ;;  %2753 = vmatmul.mubr.msk.f32.vlgmr.msra.gmra.mrb[10].mxu0 %vm1044_vm4, %v1684_v51  ;;  %v2148_v51 = vld [vmem:[%s3907_s5 + $0x20] sm:$0xff] }
 0x958   : > { %2762 = vmatprep.mubr.msk.f32.mxu0 %vm3401_vm1, %v3399_v2  ;;  %v2149_v52 = vld [vmem:[%s3907_s5 + $0x28] sm:$0xff] }
 0x95a   : > { %v1838_v0 = vpop.f32.mrb[10].mxu1 }
 0x95b   : > { %v1842_v53 = vmul.f32 0.35355338, %v1838_v0  ;;  %v2759_v54 = vpop.f32.mrb[11].mxu1  ;;  %v2927_v0 = vpack.c.bf16 %v2149_v52, %v2148_v51 }
 0x95c   : > { %v2151_v54 = vld [vmem:[%s3907_s5 + $0x38] sm:$0xff] }
 0x95d   : > { %v1843_v55 = vsel %vm1044_vm4, %v1842_v53, -inf }
 0x95e   : > { %1844 = vmax.xlane.f32.xlu0 %v1843_v55 }
 0x974   : > { %1854 = vrot.lane.b32.xlu0 %v4002_v49, %s3404_s11 }
 0x9eb   : > { %v1845_v56 = vpop.xlane.xlu0 %1844 }
 0x9ec   : > { %v1846_v57 = vsub.f32 %v1842_v53, %v1845_v56  ;;  %v2150_v53 = vld [vmem:[%s3907_s5 + $0x30] sm:$0xff]  ;;  %v2152_v56 = vld [vmem:[%s3907_s5 + $0x40] sm:$0xff] }
 0x9ed   : > { %v2930_v55 = vpack.c.bf16 %v2151_v54, %v2150_v53 }
 0x9ee   : > { %v1847_v58 = vmul.f32 1.442695, %v1846_v57  ;;  %v2153_v57 = vld [vmem:[%s3907_s5 + $0x48] sm:$0xff] }
 0x9ef   : > { %v1855_v59 = vpop.permute.xlu0 %1854 }
 0x9f0   : > { %3096 = vpow2.f32 %v1847_v58  ;;  %2761 = vmatpush3.msra.mxu0 %v1855_v59  ;;  %v2933_v58 = vpack.c.bf16 %v2153_v57, %v2152_v56  ;;  %v2154_v59 = vld [vmem:[%s3907_s5 + $0x50] sm:$0xff] }
 0x9f1   : > { %2896 = vmatprep.subr.bf16.mxu0 %v3400_v19 }
 0x9fa   : > { %v3097_v60 = vpop.eup %3096 }
 0x9fb   : > { %v1849_v61 = vsel %vm1044_vm4, %v3097_v60, 0.0 }
 0x9fc   : > { %1850 = vadd.xlane.f32.xlu1 %v1849_v61 }
 0xa2a   : > { %v1759_v63 = vpop.f32.mrb[10].mxu0 }
 0xa2b   : > { %v1763_v1 = vadd.f32 %v1759_v63, %v1519_v33  ;;  %v2754_v49 = vpop.f32.mrb[11].mxu0  ;;  %v2058_v33 = vld [vmem:[%s3859_s6 + $0x40] sm:$0xff]  ;;  %v2157_v63 = vld [vmem:[%s3907_s5 + $0x68] sm:$0xff] }
 0xa2c   : > { %v2909_v36 = vpack.c.bf16 %v2059_v34, %v2058_v33 }
 0xa89   : > { %v1851_v4 = vpop.xlane.xlu1 %1850 }
 0xa8a   : > { %3098 = vrcp.f32 %v1851_v4 }
 0xa94   : > { %v3099_v6 = vpop.eup %3098 }
 0xa95   : > { %v1853_v7 = vmul.f32 %v3099_v6, %v3097_v60  ;;  %v2155_v60 = vld [vmem:[%s3907_s5 + $0x58] sm:$0xff] }
 0xa96   : > { %v2936_v61 = vpack.c.bf16 %v2155_v60, %v2154_v59 }
 0xa97   : > { %2763 = vmatmul.mubr.msk.f32.vlgmr.msra.gmra.mrb[12].mxu0 %vm1044_vm4, %v1853_v7 }
 0xa98   : > { %2802 = vmatprep.mubr.msk.f32.mxu0 %vm3401_vm1, %v3399_v2 }
 0xb6a   : > { %v1926_v8 = vpop.f32.mrb[12].mxu0 }
 0xb6b   : > { %v2764_v10 = vpop.f32.mrb[13].mxu0  ;;  %2768 = vmatmul.mubr.msk.f32.vlgmr.msra.gmra.mrb[12].mxu1 %vm1044_vm4, %v1926_v8 }
 0xb6c   : > { %2837 = vmatprep.mubr.msk.f32.mxu1 %vm3401_vm1, %v3399_v2  ;;  %2922 = vmatpush3.bf16.msra.mxu1 %v2921_v47 }
 0xb6d   : > { %2923 = vmatprep.subr.bf16.mxu1 %v3400_v19 }
 0xb70   : > { %2925 = vmatpush3.bf16.msra.mxu1 %v2924_v50 }
 0xb71   : > { %2926 = vmatprep.subr.bf16.mxu1 %v3400_v19 }
 0xb74   : > { %2928 = vmatpush3.bf16.msra.mxu1 %v2927_v0 }
 0xb75   : > { %2929 = vmatprep.subr.bf16.mxu1 %v3400_v19 }
 0xb78   : > { %2931 = vmatpush3.bf16.msra.mxu1 %v2930_v55 }
 0xb79   : > { %2932 = vmatprep.subr.bf16.mxu1 %v3400_v19 }
 0xb7c   : > { %2934 = vmatpush3.bf16.msra.mxu1 %v2933_v58 }
 0xb7d   : > { %2935 = vmatprep.subr.bf16.mxu1 %v3400_v19 }
 0xb80   : > { %2937 = vmatpush3.bf16.msra.mxu1 %v2936_v61 }
 0xb81   : > { %2938 = vmatprep.subr.bf16.mxu1 %v3400_v19 }
 0xc3e   : > { %v2001_v11 = vpop.f32.mrb[12].mxu1 }
 0xc3f   : > { %v2005_v12 = vadd.f32 %v2001_v11, %v1763_v1  ;;  %v2769_v13 = vpop.f32.mrb[13].mxu1  ;;  %v2939_v1 = vpack.c.bf16 %v2157_v63, %v2156_v62 }
 0xc41   : > { %v2006_v15 = vadd.f32 %v2005_v12, %v3915_v5  ;;  %v2051_v5 = vld [vmem:[%s3859_s6 + $0x8] sm:$0xff]  ;;  %2940 = vmatpush3.bf16.msra.mxu1 %v2939_v1 }
 0xc42   : > { %v2897_v23 = vpack.c.bf16 %v2051_v5, %v2050_v22  ;;  %2941 = vmatprep.subr.bf16.mxu1 %v3400_v19  ;;  %v2587_v5 = vld [vmem:[%s4378_s8] ss:$0 sm:$0xff] }
 0xc43   : > { %v4099_v16 = vadd.f32 %v2584_v14, %v2006_v15  ;;  %v2586_v15 = vld [vmem:[%s790_s1] ss:$0 sm:$0xff]  ;;  %s4379_s1 = sld [smem:[#allocation43_spill]] }
 0xc44   : > { %2898 = vmatpush3.bf16.msra.mxu0 %v2897_v23 }
 0xc45   : > { %2017 = vadd.xlane.f32.xlu1 %v4099_v16  ;;  %2899 = vmatprep.subr.bf16.mxu0 %v3400_v19 }
 0xc48   : > { %2901 = vmatpush3.bf16.msra.mxu0 %v2900_v26 }
 0xc49   : > { %2902 = vmatprep.subr.bf16.mxu0 %v3400_v19  ;;  %s4380_s22 = scalar_lea.vmem %s4379_s1, %s3868_s2 }
 0xc4a   : > { %v2588_v26 = vld [vmem:[%s4380_s22] ss:$0 sm:$0xff] }
 0xc4c   : > { %2904 = vmatpush3.bf16.msra.mxu0 %v2903_v29 }
 0xc4d   : > { %2905 = vmatprep.subr.bf16.mxu0 %v3400_v19 }
 0xc50   : > { %2907 = vmatpush3.bf16.msra.mxu0 %v2906_v32 }
 0xc51   : > { %2908 = vmatprep.subr.bf16.mxu0 %v3400_v19 }
 0xc54   : > { %2910 = vmatpush3.bf16.msra.mxu0 %v2909_v36 }
 0xc55   : > { %2911 = vmatprep.subr.bf16.mxu0 %v3400_v19 }
 0xc58   : > { %2913 = vmatpush3.bf16.msra.mxu0 %v2912_v38 }
 0xc59   : > { %2914 = vmatprep.subr.bf16.mxu0 %v3400_v19 }
 0xc5c   : > { %2916 = vmatpush3.bf16.msra.mxu0 %v2915_v41 }
 0xc5d   : > { %2917 = vmatprep.subr.bf16.mxu0 %v3400_v19  ;;  %v2585_v19 = vld [vmem:[%s787_s4] ss:$0 sm:$0xff] }
 0xc60   : > { %2919 = vmatpush3.bf16.msra.mxu0 %v2918_v43 }
 0xcd2   : > { %v2018_v17 = vpop.xlane.xlu1 %2017 }
 0xcd3   : > { %v2019_v18 = vmul.f32 0.03125, %v2018_v17 }
 0xcd5   : > { %v2020_v2 = vsub.f32 %v4099_v16, %v2019_v18 }
 0xcd7   : > { %v4104_v20 = vmul.f32 %v3876_v3, %v2020_v2  ;;  %v2158_v2 = vld [vmem:[%s3907_s5 + $0x70] sm:$0xff] }
 0xcd9   : > { %v2022_v21 = vmul.f32 %v4104_v20, %v4104_v20 }
 0xcdb   : > { %2023 = vadd.xlane.f32.xlu1 %v2022_v21  ;;  %v2159_v21 = vld [vmem:[%s3907_s5 + $0x78] sm:$0xff]  ;;  %s4381_s5 = sld [smem:[#allocation22_spill]] }
 0xcdc   : > { %v2942_v22 = vpack.c.bf16 %v2159_v21, %v2158_v2 }
 0xcde   : > { %2943 = vmatpush3.bf16.msra.mxu1 %v2942_v22 }
 0xce1   : > { %p2589_p11 = scmp.ge.s32.totalorder %s4381_s5, 1 }
 0xd68   : > { %v2024_v49 = vpop.xlane.xlu1 %2023 }
 0xd69   : > { %v2025_v4 = vmul.f32 0.032258064, %v2024_v49 }
 0xd6b   : > { %3100 = vrsqrt.f32 %v2025_v4  ;;  %vm2028_vm5 = vcmp.eq.f32.partialorder %v2025_v4, inf  ;;  %v2031_v8 = vand.u32 2147483648, %v2025_v4  ;;  %vm2030_vm6 = vcmp.eq.f32.partialorder %v2025_v4, 0.0 }
 0xd75   : > { %v3101_v6 = vpop.eup %3100 }
 0xd76   : > { %v2027_v7 = vmul.f32 %v3101_v6, %v2025_v4 }
 0xd78   : > { %v2029_v10 = vsel %vm2028_vm5, %v2025_v4, %v2027_v7 }
 0xd79   : > { %v2032_v11 = vsel %vm2030_vm6, %v2031_v8, %v2029_v10 }
 0xd7a   : > { %v2033_v12 = vadd.f32 1e-06, %v2032_v11 }
 0xd7c   : > { %3102 = vrcp.f32 %v2033_v12 }
 0xd86   : > { %v3103_v13 = vpop.eup %3102 }
 0xd87   : > { %v2035_v14 = vmul.f32 %v3103_v13, %v4104_v20 }
 0xd89   : > { %v2042_v17 = vmul.f32 %v2585_v19, %v2035_v14 }
 0xd8b   : > { %v2049_v18 = vadd.f32 %v2586_v15, %v2042_v17 }
 0xd8d   : > { %2803 = vmatmul.mubr.f32.vlgmr.msra.gmra.mrb[14].mxu0 %v2049_v18 }
 0xe60   : > { %v2139_v23 = vpop.f32.mrb[14].mxu0 }
 0xe61   : > { %v2140_v24 = vadd.f32 %v2587_v5, %v2139_v23  ;;  %v2804_v20 = vpop.f32.mrb[15].mxu0 }
 0xe63   : > { %v2143_v25 = vmax.f32 %v2140_v24, 0.0 }
 0xe65   : > { %2838 = vmatmul.mubr.f32.vlgmr.msra.gmra.mrb[14].mxu1 %v2143_v25 }
 0xf35   : > { %2241 = sbr.rel (%p2589_p11) target bundleno = 3902 (0xf3e), region = 108 }
 0xf38   : > { %v2233_v27 = vpop.f32.mrb[14].mxu1 }
 0xf39   : > { %v2234_v28 = vadd.f32 %v2588_v26, %v2233_v27  ;;  %v2839_v29 = vpop.f32.mrb[15].mxu1 }
 0xf3b   : > { %v2237_v30 = vadd.f32 %v2234_v28, %v4099_v16 }
 0xf3d   : > { %2242 = vst [vmem:[#allocation2] sm:$0xff] %v2237_v30 }
 0xf3e PF: > { %s4382_s26 = sld [smem:[#allocation22_spill]] }
 0xf44   : > { %p2590_p9 = scmp.ne.s32.totalorder %s4382_s26, 1 }
 0xf45   : > { %2249 = vadd.xlane.f32.xlu0 (!%p2590_p9), %v2237_v30  ;;  %s4383_s15 = sld [smem:[#allocation48_spill]] (!%p2590_p9)  ;;  %s4384_s21 = sld [smem:[#allocation49_spill]] (!%p2590_p9) }
 0xf46   : > { %2246 = sbr.rel (%p2590_p9) target bundleno = 4238 (0x108e), region = 112 }
 0xf4b   : > { %v2592_v44 = vld [vmem:[%s4384_s21] ss:$0 sm:$0xff] (!%p2590_p9) }
 0xfd2   : > { %v2250_v31 = vpop.xlane.xlu0 %2249 }
 0xfd3   : > { %v2251_v32 = vmul.f32 0.03125, %v2250_v31 }
 0xfd5   : > { %v2252_v33 = vsub.f32 %v2237_v30, %v2251_v32 }
 0xfd7   : > { %v2253_v34 = vmul.f32 %v3876_v3, %v2252_v33  ;;  %v2591_v3 = vld [vmem:[%s4383_s15] ss:$0 sm:$0xff] }
 0xfd9   : > { %v2254_v35 = vmul.f32 %v2253_v34, %v2253_v34 }
 0xfdb   : > { %2255 = vadd.xlane.f32.xlu0 %v2254_v35 }
0x1068   : > { %v2256_v36 = vpop.xlane.xlu0 %2255 }
0x1069   : > { %v2257_v37 = vmul.f32 0.032258064, %v2256_v36 }
0x106b   : > { %3104 = vrsqrt.f32 %v2257_v37  ;;  %vm2260_vm7 = vcmp.eq.f32.partialorder %v2257_v37, inf  ;;  %v2263_v39 = vand.u32 2147483648, %v2257_v37  ;;  %vm2262_vm8 = vcmp.eq.f32.partialorder %v2257_v37, 0.0 }
0x1075   : > { %v3105_v16 = vpop.eup %3104 }
0x1076   : > { %v2259_v38 = vmul.f32 %v3105_v16, %v2257_v37 }
0x1078   : > { %v2261_v40 = vsel %vm2260_vm7, %v2257_v37, %v2259_v38 }
0x1079   : > { %v2264_v41 = vsel %vm2262_vm8, %v2263_v39, %v2261_v40 }
0x107a   : > { %v2265_v42 = vadd.f32 1e-06, %v2264_v41 }
0x107c   : > { %3106 = vrcp.f32 %v2265_v42 }
0x1086   : > { %v3107_v9 = vpop.eup %3106 }
0x1087   : > { %v2267_v43 = vmul.f32 %v3107_v9, %v2253_v34 }
0x1089   : > { %v2274_v45 = vmul.f32 %v2591_v3, %v2267_v43 }
0x108b   : > { %v2281_v46 = vadd.f32 %v2592_v44, %v2274_v45 }
0x108d   : > { %2282 = vst [vmem:[%s3911_s3] sm:$0xff] %v2281_v46 }
0x108e PF: > { %s4385_s7 = sld [smem:[#allocation23_spill]]  ;;  %s4386_s10 = sld [smem:[#allocation50_spill]] }
0x108f   : > { %s2297_s6 = sshll.u32 %s3911_s3, 4  ;;  %s2284_s30 = scalar_lea.sflag [#allocation5], %s3832_s24  ;;  %s2298_s6 = int_to_ptr.vmem [resolvable:$true] %s2297_s6 }
0x1090   : > { %s3258_s23 = scalar_lea.vmem %s2298_s6, 128  ;;  %p4387_p5 = scmp.ne.s32.totalorder %s4344_s19, 0 }
0x1091   : > { %p3259_p4 = scmp.ne.s32.totalorder %s2298_s6, %s3258_s23  ;;  %s3405_s14 = smov [#allocation12]  }
0x1092   : > { %s3262_s13 = sshll.u32 %s3405_s14, 4  ;;  %s3263_s13 = int_to_ptr.vmem [resolvable:$false] %s3262_s13 }
0x1093   : > { %p3260_p6 = pnand %p3259_p4, %p4387_p5  ;;  %s3264_s20 = scalar_lea.vmem %s3263_s13, 256 }
0x1094   : > { %s2594_s11 = sshll.u32 %s4385_s7, 7  ;;  %p3265_p12 = scmp.lt.s32.totalorder %s2298_s6, %s3263_s13 }
0x1095   : > { %s4190_s12 = scalar_lea.hbm %s4386_s10, %s2594_s11  ;;  %p3261_p13 = pneg %p3260_p6 }
0x1096   : > { %p3266_p0 = scmp.lt.s32.totalorder %s3264_s20, %s3258_s23 }
0x1098   : > { %p3267_p10 = por %p3266_p0, %p3265_p12 }
0x109a   : > { %p3268_p7 = pnand %p3267_p10, %p3261_p13 }
0x109c   : > { %3271 = shalt.err (!%p3268_p7)
}
0x109d   : > { %s3272_s24 = scalar_lea.hbm %s4190_s12, 128  ;;  %s3276_s9 = scalar_lea.hbm %s4386_s10, 256 }
0x109e   : > { %p3273_p2 = scmp.ne.s32.totalorder %s4190_s12, %s3272_s24  ;;  %p3277_p8 = scmp.lt.u32.totalorder %s4190_s12, %s4386_s10 }
0x109f   : > { %p3278_p11 = scmp.lt.u32.totalorder %s3276_s9, %s3272_s24  ;;  %p3280_p4 = scmp.lt.u32.totalorder %s3272_s24, %s4190_s12 }
0x10a0   : > { %p3274_p1 = pnand %p3273_p2, %p4387_p5 }
0x10a1   : > { %p3279_p9 = por %p3278_p11, %p3277_p8 }
0x10a2   : > { %p3275_p3 = pneg %p3274_p1 }
0x10a3   : > { %p3281_p6 = por %p3280_p4, %p3279_p9 }
0x10a5   : > { %p3282_p13 = pnand %p3281_p6, %p3275_p3 }
0x10a7   : > { %3285 = shalt.err (!%p3282_p13)
}
0x10a8   : > { %2958 = dma.vmem_to_hbm [thread:$0]  (%p4387_p5), %s2298_s6, 128, %s4190_s12, %s2284_s30  }
0x10a9 PF: > { %s4388_s4 = sld [smem:[#allocation26_spill]]  ;;  %s4389_s0 = sld [smem:[#allocation19_spill]] }
0x10aa   : > { %s4390_s1 = sld [smem:[#allocation34_spill]] }
0x10af   : > { %p2981_p12 = scmp.ge.s32.totalorder %s4388_s4, 2  ;;  %s2309_s22 = sand.u32 1, %s4389_s0  }
0x10b0   : > { %p4391_p0 = scmp.ne.s32.totalorder %s4390_s1, 0  ;;  %s2310_s5 = scalar_lea.sflag [#allocation5], %s2309_s22 }
0x10b2   : > { %p2977_p10 = pnand %p2981_p12, %p4391_p0 }
0x10b4   : > { %3343 = dma.done.wait (!%p2977_p10), %s2310_s5, 128  }
0x10b5   : > { %3345 = vsyncadd (!%p2977_p10), %s2310_s5, 4294967168  ;;  %s37_s28 = sadd.s32 1, %s4388_s4   ;;  %s4392_s18 = sld [smem:[#allocation17_spill]] }
0x10b6   : > { %p34_p7 = scmp.ge.s32.totalorder %s37_s28, 6   ;;  %s4393_s19 = sld [smem:[#allocation18_spill]] }
0x10b7   : > { %s4394_s20 = sld [smem:[#allocation32_spill]]  ;;  %s4395_s21 = sld [smem:[#allocation20_spill]] }
0x10b8   : > { %s4396_s22 = sld [smem:[#allocation21_spill]]  ;;  %s4397_s23 = sld [smem:[#allocation33_spill]] }
0x10b9   : > { %s4398_s24 = sld [smem:[#allocation24_spill]]  ;;  %s4399_s25 = sld [smem:[#allocation25_spill]] }
0x10ba   : > { %s4400_s26 = sld [smem:[#allocation28_spill]]  ;;  %s4401_s27 = sld [smem:[#allocation29_spill]] }
0x10bb   :  { %36 = sbr.rel (!%p34_p7) target bundleno = 30 (0x1e), region = 212 }
0x10c2   :  { %2315 = vsyncpa [#allocation4], 1 }
0x10c3   :  { %2317 = vsyncpa [#allocation4 + $0x1], 1 }
0x10c4   :  { %2318 = vsyncpa [#allocation7], 1 }
0x10c5   :  { %2320 = vsyncpa [#allocation7 + $0x1], 1 }
0x10c6   :  { %2321 = vsyncpa [#allocation10], 1 }
0x10c7   :  { %2323 = vsyncpa [#allocation10 + $0x1], 1 }
0x10c8   :  { %2324 = vsyncpa [#allocation5], 1 }
0x10c9   :  { %2326 = vsyncpa [#allocation5 + $0x1], 1 }

</bundles_post_ra>
